<compile_context>
chip_gen: v7x
topology: tpu7x:2x2x1
jax: 0.10.0
libtpu: 0.0.40
codegen_flags: <defaults>
</compile_context>

<pallas_src>
import jax
import jax.numpy as jnp
from jax.experimental import pallas as pl
from jax.experimental.pallas import tpu as pltpu

# ------------------------- model hyperparameters -------------------------
IN_DIM = 1024          # raw video-vector length (5 stride-3 convs need >= 485)
INNER_DIMS = (32, 32)  # VectorEncoder inner dims
OUT_DIM = 16
OUT_PAD = 128          # lane-dense output width; wrapper slices [:, :OUT_DIM]
CONV_K = 5
CONV_STRIDE = 3
N_CONV = 5
EPS = 1e-5             # InstanceNorm1d default eps

BATCH = 32             # small demo batch


def _conv_out_len(l):
    # floor((L - dilation*(k-1) - 1)/stride) + 1 with dilation=1, pad=0
    return (l - CONV_K) // CONV_STRIDE + 1


def _round_up(n, m):
    return ((n + m - 1) // m) * m


CONV_LENS = [IN_DIM]
for _ in range(N_CONV):
    CONV_LENS.append(_conv_out_len(CONV_LENS[-1]))                 # [1024, 340, 112, 36, 11, 3]
CONV_PAD = [IN_DIM] + [_round_up(l, 128) for l in CONV_LENS[1:]]   # [1024, 384, 128, 128, 128, 128]
D0, D1 = INNER_DIMS
FEAT_IN = CONV_LENS[-1]                                            # 3

# weight-slab row layout (convs #2..#5 stacked along rows; linear weights stacked along rows)
CONV_SLAB_ROWS = tuple(CONV_PAD[1:N_CONV])                         # (384, 128, 128, 128)
LIN_W0, LIN_WR0, LIN_W1, LIN_WR1, LIN_WO = 0, 128, 160, 192, 224
LIN_SLAB_ROWS = 256


def _pick_tile_m(m):
    # >= 4 grid steps (>= 2 per TensorCore on v7x) whenever the batch allows, so the
    # per-step input-block DMA double-buffers against compute; cap at 512 rows (v6e/v5e
    # roofline sweet spot, well under every scoped-VMEM default); 8-row floor.
    for t in (512, 256, 128, 64, 32, 16, 8):
        if _round_up(m, t) // t >= 4:
            return t
    return 8


# ------------------------------ kernel ------------------------------
def _swish(x):
    # x * sigmoid(x); exp argument clamped so no inf reaches the approximate reciprocal,
    # and the divide goes to the EUP slot instead of the VPU.
    z = jnp.exp(jnp.minimum(-x, 80.0))
    return x * pl.reciprocal(1.0 + z, approx=True)


def _encoder_kernel(x_ref, c1w_ref, cw_ref, lw_ref, cb_ref, lb_ref, out_ref):
    # ---- downsize_net: 5 x (Conv1d(1,1,5,stride=3) -> Swish) as banded bf16 matmuls ----
    # conv #1: raw x block against the VMEM-resident (1024, 384) banded weight.
    h = jnp.dot(x_ref[...].astype(jnp.bfloat16), c1w_ref[...],
                preferred_element_type=jnp.float32)
    h = _swish(h + cb_ref[0:1, :])                        # (tile_m, 384); padded lanes stay 0

    # convs #2..#5: slices of the stacked (768, 128) slab (static slices -> free).
    row = 0
    for idx, nrows in enumerate(CONV_SLAB_ROWS):
        w = cw_ref[row:row + nrows, :]
        b = cb_ref[idx + 1:idx + 2, 0:CONV_PAD[idx + 2]]
        h = _swish(jnp.dot(h.astype(jnp.bfloat16), w,
                           preferred_element_type=jnp.float32) + b)
        row += nrows

    # ---- VectorEncoder.network ----
    def lin(hh, r0, d_in, d_out, brow):
        w = lw_ref[r0:r0 + d_in, 0:d_out]
        b = lb_ref[brow:brow + 1, 0:d_out]
        return jnp.dot(hh.astype(jnp.bfloat16), w,
                       preferred_element_type=jnp.float32) + b

    h = lin(h, LIN_W0, 128, D0, 0)                        # Linear(feat_in=3, d0); zero rows kill padded lanes

    # InstanceNorm1d(affine=False, track_running_stats=False) seen with C=1:
    # per-row normalization over the d0 features, biased variance, eps=1e-5.
    mu = jnp.mean(h, axis=-1, keepdims=True)
    var = jnp.mean((h - mu) * (h - mu), axis=-1, keepdims=True)
    h = (h - mu) * jax.lax.rsqrt(var + EPS)

    h = _swish(h)
    h = h + _swish(lin(h, LIN_WR0, D0, D0, 1))            # ResidualBlock(d0)
    h = _swish(lin(h, LIN_W1, D0, D1, 2))                 # Linear(d0, d1) -> Swish
    h = h + _swish(lin(h, LIN_WR1, D1, D1, 3))            # ResidualBlock(d1)

    # Final Linear(d1, out_dim), zero-padded to 128 output lanes (lane-dense store);
    # `.squeeze()` of (B, 1, out) -> (B, out) is implicit in our layout.
    out_ref[...] = lin(h, LIN_WO, D1, OUT_PAD, 4).astype(out_ref.dtype)


# ------------------------------ wrapper ------------------------------
def _cost_estimate(m_pad):
    dot_kn = ([(IN_DIM, CONV_PAD[1])] + list(zip(CONV_PAD[1:-1], CONV_PAD[2:]))
              + [(128, D0), (D0, D0), (D0, D1), (D1, D1), (D1, OUT_PAD)])
    flops = 2 * m_pad * sum(k * n for k, n in dot_kn)
    transcendentals = 2 * m_pad * (sum(CONV_PAD[1:]) + 2 * D0 + 2 * D1)
    weight_bytes = 2 * sum(k * n for k, n in dot_kn) + 4 * (8 * CONV_PAD[1] + 8 * 128)
    bytes_accessed = 4 * m_pad * IN_DIM + weight_bytes + 4 * m_pad * OUT_PAD
    return pl.CostEstimate(flops=flops, transcendentals=transcendentals,
                           bytes_accessed=bytes_accessed)


def video_vector_encoder(x, params, *, tile_m=None):
    c1w, cw, lw, cb, lb = params
    m = x.shape[0]
    if tile_m is None:
        tile_m = _pick_tile_m(m)
    m_pad = _round_up(m, tile_m)
    if m_pad != m:
        x = jnp.pad(x, ((0, m_pad - m), (0, 0)))

    def resident(w):   # constant block index -> fetched once, stays VMEM-resident
        return pl.BlockSpec(w.shape, lambda i: (0,) * w.ndim)

    out = pl.pallas_call(
        _encoder_kernel,
        out_shape=jax.ShapeDtypeStruct((m_pad, OUT_PAD), jnp.float32),
        grid=(m_pad // tile_m,),
        in_specs=[pl.BlockSpec((tile_m, IN_DIM), lambda i: (i, 0)),   # raw x rows (no im2col)
                  resident(c1w), resident(cw), resident(lw),
                  resident(cb), resident(lb)],
        out_specs=pl.BlockSpec((tile_m, OUT_PAD), lambda i: (i, 0)),  # lane-dense output block
        compiler_params=pltpu.CompilerParams(dimension_semantics=("parallel",)),
        cost_estimate=_cost_estimate(m_pad),
    )(x, c1w, cw, lw, cb, lb)
    return out[:m, :OUT_DIM]


# ------------------------------ params ------------------------------
def init_params(key):
    """Deterministic synthetic parameters (PyTorch-style uniform fan-in init),
    packed into 3 bf16 weight slabs + 2 f32 bias slabs (6 kernel operands total)."""
    keys = iter(jax.random.split(key, 16))

    bound_c = 1.0 / (CONV_K ** 0.5)
    conv_w = [jax.random.uniform(next(keys), (CONV_K,), jnp.float32, -bound_c, bound_c)
              for _ in range(N_CONV)]
    conv_b = [jax.random.uniform(next(keys), (), jnp.float32, -bound_c, bound_c)
              for _ in range(N_CONV)]

    def banded(w, l_in_pad, l_out, l_out_pad):
        # (l_in_pad, l_out_pad) with M[stride*j + k, j] = w[k]; padded rows/cols stay zero.
        j = jnp.arange(l_out)
        rows = j[None, :] * CONV_STRIDE + jnp.arange(CONV_K)[:, None]
        cols = jnp.broadcast_to(j[None, :], (CONV_K, l_out))
        return jnp.zeros((l_in_pad, l_out_pad), jnp.float32).at[rows, cols].set(
            jnp.broadcast_to(w[:, None], (CONV_K, l_out)))

    c1w = banded(conv_w[0], IN_DIM, CONV_LENS[1], CONV_PAD[1])                 # (1024, 384)
    cw = jnp.concatenate(
        [banded(conv_w[i], CONV_PAD[i], CONV_LENS[i + 1], CONV_PAD[i + 1])
         for i in range(1, N_CONV)], axis=0)                                   # (768, 128)

    # conv biases: zero in padded lanes so padded lanes stay exactly 0 after bias+swish.
    cb = jnp.zeros((8, CONV_PAD[1]), jnp.float32)
    cb = cb.at[0, :CONV_LENS[1]].set(conv_b[0])
    for i in range(1, N_CONV):
        cb = cb.at[i, :CONV_LENS[i + 1]].set(conv_b[i])

    lw = jnp.zeros((LIN_SLAB_ROWS, 128), jnp.float32)
    lb = jnp.zeros((8, 128), jnp.float32)

    def place(lw, lb, k, row0, brow, d_in, d_out):
        k1, k2 = jax.random.split(k)
        bound = 1.0 / (d_in ** 0.5)
        w = jax.random.uniform(k1, (d_in, d_out), jnp.float32, -bound, bound)
        b = jax.random.uniform(k2, (d_out,), jnp.float32, -bound, bound)
        return lw.at[row0:row0 + d_in, :d_out].set(w), lb.at[brow, :d_out].set(b)

    lw, lb = place(lw, lb, next(keys), LIN_W0, 0, FEAT_IN, D0)    # Linear(3, d0); rows 3..127 zero
    lw, lb = place(lw, lb, next(keys), LIN_WR0, 1, D0, D0)        # ResidualBlock(d0)
    lw, lb = place(lw, lb, next(keys), LIN_W1, 2, D0, D1)         # Linear(d0, d1)
    lw, lb = place(lw, lb, next(keys), LIN_WR1, 3, D1, D1)        # ResidualBlock(d1)
    lw, lb = place(lw, lb, next(keys), LIN_WO, 4, D1, OUT_DIM)    # final Linear; cols 16..127 zero

    return (c1w.astype(jnp.bfloat16), cw.astype(jnp.bfloat16),
            lw.astype(jnp.bfloat16), cb, lb)


if __name__ == "__main__":
    key = jax.random.PRNGKey(0)
    kx, kp = jax.random.split(key)
    x = jax.random.normal(kx, (BATCH, IN_DIM), jnp.float32)
    params = init_params(kp)

    encode = jax.jit(video_vector_encoder)
    out = encode(x, params)
    jax.block_until_ready(out)
    assert out.shape == (BATCH, OUT_DIM), out.shape
    assert bool(jnp.all(jnp.isfinite(out)))
    print("KERNEL_OK")
</pallas_src>

<mosaic_0001>
module attributes {stable_mosaic.version = 11 : i64} {
  func.func @_encoder_kernel(%arg0: i32, %arg1: memref<8x1024xf32, #tpu.memory_space<vmem>>, %arg2: memref<1024x384xbf16, #tpu.memory_space<vmem>>, %arg3: memref<768x128xbf16, #tpu.memory_space<vmem>>, %arg4: memref<256x128xbf16, #tpu.memory_space<vmem>>, %arg5: memref<8x384xf32, #tpu.memory_space<vmem>>, %arg6: memref<8x128xf32, #tpu.memory_space<vmem>>, %arg7: memref<8x128xf32, #tpu.memory_space<vmem>>) attributes {dimension_semantics = [#tpu.dimension_semantics<parallel>], iteration_bounds = array<i64: 4>, scalar_prefetch = 0 : i64, scratch_operands = 0 : i64, tpu.core_type = #tpu.core_type<tc>, window_params = [{transform_indices = @transform_0, window_bounds = array<i64: 8, 1024>}, {pipeline_mode = #tpu.pipeline_mode<synchronous>, transform_indices = @transform_1, window_bounds = array<i64: 1024, 384>}, {pipeline_mode = #tpu.pipeline_mode<synchronous>, transform_indices = @transform_2, window_bounds = array<i64: 768, 128>}, {pipeline_mode = #tpu.pipeline_mode<synchronous>, transform_indices = @transform_3, window_bounds = array<i64: 256, 128>}, {pipeline_mode = #tpu.pipeline_mode<synchronous>, transform_indices = @transform_4, window_bounds = array<i64: 8, 384>}, {pipeline_mode = #tpu.pipeline_mode<synchronous>, transform_indices = @transform_5, window_bounds = array<i64: 8, 128>}, {transform_indices = @transform_6, window_bounds = array<i64: 8, 128>}]} {
    %c0 = arith.constant 0 : index
    %c0_0 = arith.constant 0 : index
    %0 = vector.load %arg1[%c0, %c0_0] : memref<8x1024xf32, #tpu.memory_space<vmem>>, vector<8x1024xf32>
    %1 = arith.truncf %0 : vector<8x1024xf32> to vector<8x1024xbf16>
    %c0_1 = arith.constant 0 : index
    %c0_2 = arith.constant 0 : index
    %2 = vector.load %arg2[%c0_1, %c0_2] : memref<1024x384xbf16, #tpu.memory_space<vmem>>, vector<1024x384xbf16>
    %cst = arith.constant dense<0.000000e+00> : vector<8x384xf32>
    %3 = tpu.matmul %1, %2, %cst {dimension_numbers = #tpu.dot_dimension_numbers<[1], [0], [0], [1], [0, 0, 1, 1], [], []>} : vector<8x1024xbf16>, vector<1024x384xbf16>, vector<8x384xf32> -> vector<8x384xf32>
    %c0_3 = arith.constant 0 : index
    %c0_4 = arith.constant 0 : index
    %4 = vector.load %arg5[%c0_3, %c0_4] : memref<8x384xf32, #tpu.memory_space<vmem>>, vector<1x384xf32>
    %5 = vector.broadcast %4 : vector<1x384xf32> to vector<8x384xf32>
    %6 = arith.addf %3, %5 : vector<8x384xf32>
    %cst_5 = arith.constant 0.000000e+00 : f32
    %7 = vector.broadcast %cst_5 : f32 to vector<8x384xf32>
    %8 = arith.subf %7, %6 : vector<8x384xf32>
    %cst_6 = arith.constant 8.000000e+01 : f32
    %9 = vector.broadcast %cst_6 : f32 to vector<8x384xf32>
    %10 = arith.minimumf %8, %9 : vector<8x384xf32>
    %11 = math.exp %10 : vector<8x384xf32>
    %cst_7 = arith.constant 1.000000e+00 : f32
    %12 = vector.broadcast %cst_7 : f32 to vector<8x384xf32>
    %13 = arith.addf %12, %11 : vector<8x384xf32>
    %14 = tpu.reciprocal %13 {approx = true} : vector<8x384xf32> -> vector<8x384xf32>
    %15 = arith.mulf %6, %14 : vector<8x384xf32>
    %c0_8 = arith.constant 0 : index
    %c0_9 = arith.constant 0 : index
    %16 = vector.load %arg3[%c0_8, %c0_9] : memref<768x128xbf16, #tpu.memory_space<vmem>>, vector<384x128xbf16>
    %c1 = arith.constant 1 : index
    %c0_10 = arith.constant 0 : index
    %17 = vector.load %arg5[%c1, %c0_10] : memref<8x384xf32, #tpu.memory_space<vmem>>, vector<1x128xf32>
    %18 = arith.truncf %15 : vector<8x384xf32> to vector<8x384xbf16>
    %cst_11 = arith.constant dense<0.000000e+00> : vector<8x128xf32>
    %19 = tpu.matmul %18, %16, %cst_11 {dimension_numbers = #tpu.dot_dimension_numbers<[1], [0], [0], [1], [0, 0, 1, 1], [], []>} : vector<8x384xbf16>, vector<384x128xbf16>, vector<8x128xf32> -> vector<8x128xf32>
    %20 = vector.broadcast %17 : vector<1x128xf32> to vector<8x128xf32>
    %21 = arith.addf %19, %20 : vector<8x128xf32>
    %cst_12 = arith.constant 0.000000e+00 : f32
    %22 = vector.broadcast %cst_12 : f32 to vector<8x128xf32>
    %23 = arith.subf %22, %21 : vector<8x128xf32>
    %cst_13 = arith.constant 8.000000e+01 : f32
    %24 = vector.broadcast %cst_13 : f32 to vector<8x128xf32>
    %25 = arith.minimumf %23, %24 : vector<8x128xf32>
    %26 = math.exp %25 : vector<8x128xf32>
    %cst_14 = arith.constant 1.000000e+00 : f32
    %27 = vector.broadcast %cst_14 : f32 to vector<8x128xf32>
    %28 = arith.addf %27, %26 : vector<8x128xf32>
    %29 = tpu.reciprocal %28 {approx = true} : vector<8x128xf32> -> vector<8x128xf32>
    %30 = arith.mulf %21, %29 : vector<8x128xf32>
    %c384 = arith.constant 384 : index
    %c0_15 = arith.constant 0 : index
    %31 = vector.load %arg3[%c384, %c0_15] : memref<768x128xbf16, #tpu.memory_space<vmem>>, vector<128x128xbf16>
    %c2 = arith.constant 2 : index
    %c0_16 = arith.constant 0 : index
    %32 = vector.load %arg5[%c2, %c0_16] : memref<8x384xf32, #tpu.memory_space<vmem>>, vector<1x128xf32>
    %33 = arith.truncf %30 : vector<8x128xf32> to vector<8x128xbf16>
    %cst_17 = arith.constant dense<0.000000e+00> : vector<8x128xf32>
    %34 = tpu.matmul %33, %31, %cst_17 {dimension_numbers = #tpu.dot_dimension_numbers<[1], [0], [0], [1], [0, 0, 1, 1], [], []>} : vector<8x128xbf16>, vector<128x128xbf16>, vector<8x128xf32> -> vector<8x128xf32>
    %35 = vector.broadcast %32 : vector<1x128xf32> to vector<8x128xf32>
    %36 = arith.addf %34, %35 : vector<8x128xf32>
    %cst_18 = arith.constant 0.000000e+00 : f32
    %37 = vector.broadcast %cst_18 : f32 to vector<8x128xf32>
    %38 = arith.subf %37, %36 : vector<8x128xf32>
    %cst_19 = arith.constant 8.000000e+01 : f32
    %39 = vector.broadcast %cst_19 : f32 to vector<8x128xf32>
    %40 = arith.minimumf %38, %39 : vector<8x128xf32>
    %41 = math.exp %40 : vector<8x128xf32>
    %cst_20 = arith.constant 1.000000e+00 : f32
    %42 = vector.broadcast %cst_20 : f32 to vector<8x128xf32>
    %43 = arith.addf %42, %41 : vector<8x128xf32>
    %44 = tpu.reciprocal %43 {approx = true} : vector<8x128xf32> -> vector<8x128xf32>
    %45 = arith.mulf %36, %44 : vector<8x128xf32>
    %c512 = arith.constant 512 : index
    %c0_21 = arith.constant 0 : index
    %46 = vector.load %arg3[%c512, %c0_21] : memref<768x128xbf16, #tpu.memory_space<vmem>>, vector<128x128xbf16>
    %c3 = arith.constant 3 : index
    %c0_22 = arith.constant 0 : index
    %47 = vector.load %arg5[%c3, %c0_22] : memref<8x384xf32, #tpu.memory_space<vmem>>, vector<1x128xf32>
    %48 = arith.truncf %45 : vector<8x128xf32> to vector<8x128xbf16>
    %cst_23 = arith.constant dense<0.000000e+00> : vector<8x128xf32>
    %49 = tpu.matmul %48, %46, %cst_23 {dimension_numbers = #tpu.dot_dimension_numbers<[1], [0], [0], [1], [0, 0, 1, 1], [], []>} : vector<8x128xbf16>, vector<128x128xbf16>, vector<8x128xf32> -> vector<8x128xf32>
    %50 = vector.broadcast %47 : vector<1x128xf32> to vector<8x128xf32>
    %51 = arith.addf %49, %50 : vector<8x128xf32>
    %cst_24 = arith.constant 0.000000e+00 : f32
    %52 = vector.broadcast %cst_24 : f32 to vector<8x128xf32>
    %53 = arith.subf %52, %51 : vector<8x128xf32>
    %cst_25 = arith.constant 8.000000e+01 : f32
    %54 = vector.broadcast %cst_25 : f32 to vector<8x128xf32>
    %55 = arith.minimumf %53, %54 : vector<8x128xf32>
    %56 = math.exp %55 : vector<8x128xf32>
    %cst_26 = arith.constant 1.000000e+00 : f32
    %57 = vector.broadcast %cst_26 : f32 to vector<8x128xf32>
    %58 = arith.addf %57, %56 : vector<8x128xf32>
    %59 = tpu.reciprocal %58 {approx = true} : vector<8x128xf32> -> vector<8x128xf32>
    %60 = arith.mulf %51, %59 : vector<8x128xf32>
    %c640 = arith.constant 640 : index
    %c0_27 = arith.constant 0 : index
    %61 = vector.load %arg3[%c640, %c0_27] : memref<768x128xbf16, #tpu.memory_space<vmem>>, vector<128x128xbf16>
    %c4 = arith.constant 4 : index
    %c0_28 = arith.constant 0 : index
    %62 = vector.load %arg5[%c4, %c0_28] : memref<8x384xf32, #tpu.memory_space<vmem>>, vector<1x128xf32>
    %63 = arith.truncf %60 : vector<8x128xf32> to vector<8x128xbf16>
    %cst_29 = arith.constant dense<0.000000e+00> : vector<8x128xf32>
    %64 = tpu.matmul %63, %61, %cst_29 {dimension_numbers = #tpu.dot_dimension_numbers<[1], [0], [0], [1], [0, 0, 1, 1], [], []>} : vector<8x128xbf16>, vector<128x128xbf16>, vector<8x128xf32> -> vector<8x128xf32>
    %65 = vector.broadcast %62 : vector<1x128xf32> to vector<8x128xf32>
    %66 = arith.addf %64, %65 : vector<8x128xf32>
    %cst_30 = arith.constant 0.000000e+00 : f32
    %67 = vector.broadcast %cst_30 : f32 to vector<8x128xf32>
    %68 = arith.subf %67, %66 : vector<8x128xf32>
    %cst_31 = arith.constant 8.000000e+01 : f32
    %69 = vector.broadcast %cst_31 : f32 to vector<8x128xf32>
    %70 = arith.minimumf %68, %69 : vector<8x128xf32>
    %71 = math.exp %70 : vector<8x128xf32>
    %cst_32 = arith.constant 1.000000e+00 : f32
    %72 = vector.broadcast %cst_32 : f32 to vector<8x128xf32>
    %73 = arith.addf %72, %71 : vector<8x128xf32>
    %74 = tpu.reciprocal %73 {approx = true} : vector<8x128xf32> -> vector<8x128xf32>
    %75 = arith.mulf %66, %74 : vector<8x128xf32>
    %c0_33 = arith.constant 0 : index
    %c0_34 = arith.constant 0 : index
    %76 = vector.load %arg4[%c0_33, %c0_34] : memref<256x128xbf16, #tpu.memory_space<vmem>>, vector<128x32xbf16>
    %c0_35 = arith.constant 0 : index
    %c0_36 = arith.constant 0 : index
    %77 = vector.load %arg6[%c0_35, %c0_36] : memref<8x128xf32, #tpu.memory_space<vmem>>, vector<1x32xf32>
    %78 = arith.truncf %75 : vector<8x128xf32> to vector<8x128xbf16>
    %cst_37 = arith.constant dense<0.000000e+00> : vector<8x32xf32>
    %79 = tpu.matmul %78, %76, %cst_37 {dimension_numbers = #tpu.dot_dimension_numbers<[1], [0], [0], [1], [0, 0, 1, 1], [], []>} : vector<8x128xbf16>, vector<128x32xbf16>, vector<8x32xf32> -> vector<8x32xf32>
    %80 = vector.broadcast %77 : vector<1x32xf32> to vector<8x32xf32>
    %81 = arith.addf %79, %80 : vector<8x32xf32>
    %cst_38 = arith.constant dense<0.000000e+00> : vector<8xf32>
    %82 = vector.multi_reduction <add>, %81, %cst_38 [1] : vector<8x32xf32> to vector<8xf32>
    %83 = vector.shape_cast %82 : vector<8xf32> to vector<8x1xf32>
    %cst_39 = arith.constant 3.200000e+01 : f32
    %84 = vector.broadcast %cst_39 : f32 to vector<8x1xf32>
    %85 = arith.divf %83, %84 : vector<8x1xf32>
    %86 = vector.broadcast %85 : vector<8x1xf32> to vector<8x32xf32>
    %87 = arith.subf %81, %86 : vector<8x32xf32>
    %88 = vector.broadcast %85 : vector<8x1xf32> to vector<8x32xf32>
    %89 = arith.subf %81, %88 : vector<8x32xf32>
    %90 = arith.mulf %87, %89 : vector<8x32xf32>
    %cst_40 = arith.constant dense<0.000000e+00> : vector<8xf32>
    %91 = vector.multi_reduction <add>, %90, %cst_40 [1] : vector<8x32xf32> to vector<8xf32>
    %92 = vector.shape_cast %91 : vector<8xf32> to vector<8x1xf32>
    %cst_41 = arith.constant 3.200000e+01 : f32
    %93 = vector.broadcast %cst_41 : f32 to vector<8x1xf32>
    %94 = arith.divf %92, %93 : vector<8x1xf32>
    %95 = vector.broadcast %85 : vector<8x1xf32> to vector<8x32xf32>
    %96 = arith.subf %81, %95 : vector<8x32xf32>
    %cst_42 = arith.constant 9.99999974E-6 : f32
    %97 = vector.broadcast %cst_42 : f32 to vector<8x1xf32>
    %98 = arith.addf %94, %97 : vector<8x1xf32>
    %99 = math.rsqrt %98 : vector<8x1xf32>
    %100 = vector.broadcast %99 : vector<8x1xf32> to vector<8x32xf32>
    %101 = arith.mulf %96, %100 : vector<8x32xf32>
    %cst_43 = arith.constant 0.000000e+00 : f32
    %102 = vector.broadcast %cst_43 : f32 to vector<8x32xf32>
    %103 = arith.subf %102, %101 : vector<8x32xf32>
    %cst_44 = arith.constant 8.000000e+01 : f32
    %104 = vector.broadcast %cst_44 : f32 to vector<8x32xf32>
    %105 = arith.minimumf %103, %104 : vector<8x32xf32>
    %106 = math.exp %105 : vector<8x32xf32>
    %cst_45 = arith.constant 1.000000e+00 : f32
    %107 = vector.broadcast %cst_45 : f32 to vector<8x32xf32>
    %108 = arith.addf %107, %106 : vector<8x32xf32>
    %109 = tpu.reciprocal %108 {approx = true} : vector<8x32xf32> -> vector<8x32xf32>
    %110 = arith.mulf %101, %109 : vector<8x32xf32>
    %c128 = arith.constant 128 : index
    %c0_46 = arith.constant 0 : index
    %111 = vector.load %arg4[%c128, %c0_46] : memref<256x128xbf16, #tpu.memory_space<vmem>>, vector<32x32xbf16>
    %c1_47 = arith.constant 1 : index
    %c0_48 = arith.constant 0 : index
    %112 = vector.load %arg6[%c1_47, %c0_48] : memref<8x128xf32, #tpu.memory_space<vmem>>, vector<1x32xf32>
    %113 = arith.truncf %110 : vector<8x32xf32> to vector<8x32xbf16>
    %cst_49 = arith.constant dense<0.000000e+00> : vector<8x32xf32>
    %114 = tpu.matmul %113, %111, %cst_49 {dimension_numbers = #tpu.dot_dimension_numbers<[1], [0], [0], [1], [0, 0, 1, 1], [], []>} : vector<8x32xbf16>, vector<32x32xbf16>, vector<8x32xf32> -> vector<8x32xf32>
    %115 = vector.broadcast %112 : vector<1x32xf32> to vector<8x32xf32>
    %116 = arith.addf %114, %115 : vector<8x32xf32>
    %cst_50 = arith.constant 0.000000e+00 : f32
    %117 = vector.broadcast %cst_50 : f32 to vector<8x32xf32>
    %118 = arith.subf %117, %116 : vector<8x32xf32>
    %cst_51 = arith.constant 8.000000e+01 : f32
    %119 = vector.broadcast %cst_51 : f32 to vector<8x32xf32>
    %120 = arith.minimumf %118, %119 : vector<8x32xf32>
    %121 = math.exp %120 : vector<8x32xf32>
    %cst_52 = arith.constant 1.000000e+00 : f32
    %122 = vector.broadcast %cst_52 : f32 to vector<8x32xf32>
    %123 = arith.addf %122, %121 : vector<8x32xf32>
    %124 = tpu.reciprocal %123 {approx = true} : vector<8x32xf32> -> vector<8x32xf32>
    %125 = arith.mulf %116, %124 : vector<8x32xf32>
    %126 = arith.addf %110, %125 : vector<8x32xf32>
    %c160 = arith.constant 160 : index
    %c0_53 = arith.constant 0 : index
    %127 = vector.load %arg4[%c160, %c0_53] : memref<256x128xbf16, #tpu.memory_space<vmem>>, vector<32x32xbf16>
    %c2_54 = arith.constant 2 : index
    %c0_55 = arith.constant 0 : index
    %128 = vector.load %arg6[%c2_54, %c0_55] : memref<8x128xf32, #tpu.memory_space<vmem>>, vector<1x32xf32>
    %129 = arith.truncf %126 : vector<8x32xf32> to vector<8x32xbf16>
    %cst_56 = arith.constant dense<0.000000e+00> : vector<8x32xf32>
    %130 = tpu.matmul %129, %127, %cst_56 {dimension_numbers = #tpu.dot_dimension_numbers<[1], [0], [0], [1], [0, 0, 1, 1], [], []>} : vector<8x32xbf16>, vector<32x32xbf16>, vector<8x32xf32> -> vector<8x32xf32>
    %131 = vector.broadcast %128 : vector<1x32xf32> to vector<8x32xf32>
    %132 = arith.addf %130, %131 : vector<8x32xf32>
    %cst_57 = arith.constant 0.000000e+00 : f32
    %133 = vector.broadcast %cst_57 : f32 to vector<8x32xf32>
    %134 = arith.subf %133, %132 : vector<8x32xf32>
    %cst_58 = arith.constant 8.000000e+01 : f32
    %135 = vector.broadcast %cst_58 : f32 to vector<8x32xf32>
    %136 = arith.minimumf %134, %135 : vector<8x32xf32>
    %137 = math.exp %136 : vector<8x32xf32>
    %cst_59 = arith.constant 1.000000e+00 : f32
    %138 = vector.broadcast %cst_59 : f32 to vector<8x32xf32>
    %139 = arith.addf %138, %137 : vector<8x32xf32>
    %140 = tpu.reciprocal %139 {approx = true} : vector<8x32xf32> -> vector<8x32xf32>
    %141 = arith.mulf %132, %140 : vector<8x32xf32>
    %c192 = arith.constant 192 : index
    %c0_60 = arith.constant 0 : index
    %142 = vector.load %arg4[%c192, %c0_60] : memref<256x128xbf16, #tpu.memory_space<vmem>>, vector<32x32xbf16>
    %c3_61 = arith.constant 3 : index
    %c0_62 = arith.constant 0 : index
    %143 = vector.load %arg6[%c3_61, %c0_62] : memref<8x128xf32, #tpu.memory_space<vmem>>, vector<1x32xf32>
    %144 = arith.truncf %141 : vector<8x32xf32> to vector<8x32xbf16>
    %cst_63 = arith.constant dense<0.000000e+00> : vector<8x32xf32>
    %145 = tpu.matmul %144, %142, %cst_63 {dimension_numbers = #tpu.dot_dimension_numbers<[1], [0], [0], [1], [0, 0, 1, 1], [], []>} : vector<8x32xbf16>, vector<32x32xbf16>, vector<8x32xf32> -> vector<8x32xf32>
    %146 = vector.broadcast %143 : vector<1x32xf32> to vector<8x32xf32>
    %147 = arith.addf %145, %146 : vector<8x32xf32>
    %cst_64 = arith.constant 0.000000e+00 : f32
    %148 = vector.broadcast %cst_64 : f32 to vector<8x32xf32>
    %149 = arith.subf %148, %147 : vector<8x32xf32>
    %cst_65 = arith.constant 8.000000e+01 : f32
    %150 = vector.broadcast %cst_65 : f32 to vector<8x32xf32>
    %151 = arith.minimumf %149, %150 : vector<8x32xf32>
    %152 = math.exp %151 : vector<8x32xf32>
    %cst_66 = arith.constant 1.000000e+00 : f32
    %153 = vector.broadcast %cst_66 : f32 to vector<8x32xf32>
    %154 = arith.addf %153, %152 : vector<8x32xf32>
    %155 = tpu.reciprocal %154 {approx = true} : vector<8x32xf32> -> vector<8x32xf32>
    %156 = arith.mulf %147, %155 : vector<8x32xf32>
    %157 = arith.addf %141, %156 : vector<8x32xf32>
    %c224 = arith.constant 224 : index
    %c0_67 = arith.constant 0 : index
    %158 = vector.load %arg4[%c224, %c0_67] : memref<256x128xbf16, #tpu.memory_space<vmem>>, vector<32x128xbf16>
    %c4_68 = arith.constant 4 : index
    %c0_69 = arith.constant 0 : index
    %159 = vector.load %arg6[%c4_68, %c0_69] : memref<8x128xf32, #tpu.memory_space<vmem>>, vector<1x128xf32>
    %160 = arith.truncf %157 : vector<8x32xf32> to vector<8x32xbf16>
    %cst_70 = arith.constant dense<0.000000e+00> : vector<8x128xf32>
    %161 = tpu.matmul %160, %158, %cst_70 {dimension_numbers = #tpu.dot_dimension_numbers<[1], [0], [0], [1], [0, 0, 1, 1], [], []>} : vector<8x32xbf16>, vector<32x128xbf16>, vector<8x128xf32> -> vector<8x128xf32>
    %162 = vector.broadcast %159 : vector<1x128xf32> to vector<8x128xf32>
    %163 = arith.addf %161, %162 : vector<8x128xf32>
    %c0_71 = arith.constant 0 : index
    %c0_72 = arith.constant 0 : index
    %164 = vector.load %arg7[%c0_71, %c0_72] : memref<8x128xf32, #tpu.memory_space<vmem>>, vector<8x128xf32>
    tpu.vector_store %arg7[%c0_71, %c0_72], %163 {strides = array<i32>} : memref<8x128xf32, #tpu.memory_space<vmem>>, vector<8x128xf32>,
    return
  }
  func.func @transform_0(%arg0: i32) -> (i32, i32) {
    %c0_i32 = arith.constant 0 : i32
    %c0_i32_0 = arith.constant 0 : i32
    return %arg0, %c0_i32 : i32, i32
  }
  func.func @transform_1(%arg0: i32) -> (i32, i32) {
    %c0_i32 = arith.constant 0 : i32
    %c0_i32_0 = arith.constant 0 : i32
    %c0_i32_1 = arith.constant 0 : i32
    return %c0_i32, %c0_i32_0 : i32, i32
  }
  func.func @transform_2(%arg0: i32) -> (i32, i32) {
    %c0_i32 = arith.constant 0 : i32
    %c0_i32_0 = arith.constant 0 : i32
    %c0_i32_1 = arith.constant 0 : i32
    return %c0_i32, %c0_i32_0 : i32, i32
  }
  func.func @transform_3(%arg0: i32) -> (i32, i32) {
    %c0_i32 = arith.constant 0 : i32
    %c0_i32_0 = arith.constant 0 : i32
    %c0_i32_1 = arith.constant 0 : i32
    return %c0_i32, %c0_i32_0 : i32, i32
  }
  func.func @transform_4(%arg0: i32) -> (i32, i32) {
    %c0_i32 = arith.constant 0 : i32
    %c0_i32_0 = arith.constant 0 : i32
    %c0_i32_1 = arith.constant 0 : i32
    return %c0_i32, %c0_i32_0 : i32, i32
  }
  func.func @transform_5(%arg0: i32) -> (i32, i32) {
    %c0_i32 = arith.constant 0 : i32
    %c0_i32_0 = arith.constant 0 : i32
    %c0_i32_1 = arith.constant 0 : i32
    return %c0_i32, %c0_i32_0 : i32, i32
  }
  func.func @transform_6(%arg0: i32) -> (i32, i32) {
    %c0_i32 = arith.constant 0 : i32
    %c0_i32_0 = arith.constant 0 : i32
    return %arg0, %c0_i32 : i32, i32
  }
}

</mosaic_0001>

<bundles_post_ra>
// kernel: video_vector_encoder.1
= control target key start
LH: loop header
LB: loop body
LE: loop exit
PB: predicated region body
PF: predicated region fallthrough
CT: control target
= control target key end

     0   :  { %11 = vsyncpa [#allocation3], 0  ;;  %s4757_s0 = inlined_call_operand.hbm [shape: f32[32,1024], index: 0, kind: input, shape index: {}]   ;;  %s4758_s1 = inlined_call_operand.hbm [shape: bf16[1024,384], index: 1, kind: input, shape index: {}]   ;;  %s4759_s2 = inlined_call_operand.hbm [shape: bf16[768,128], index: 2, kind: input, shape index: {}]   ;;  %s4760_s3 = inlined_call_operand.hbm [shape: bf16[256,128], index: 3, kind: input, shape index: {}]   ;;  %s4761_s4 = inlined_call_operand.hbm [shape: f32[8,384], index: 4, kind: input, shape index: {}]   ;;  %s4762_s5 = inlined_call_operand.vmem [shape: f32[8,128], index: 5, kind: input, shape index: {}]   ;;  %s4763_s6 = inlined_call_operand.vmem [shape: f32[32,128], index: 6, kind: output, shape index: {}]  }
   0x1   :  { %13 = vsyncpa [#allocation3 + $0x1], 0 }
   0x2   :  { %14 = vsyncpa [#allocation5], 0 }
   0x3   :  { %15 = vsyncpa [#allocation8], 0  ;;  %s4406_s21 = smov 0   ;;  %s4408_s22 = smov 0  }
   0x4   :  { %s4410_s23 = smov 0   ;;  %s4412_s24 = smov 0  }
   0x5 LB: > { %s4360_s25 = smov [#allocation4]   ;;  %s4427_s27 = sadd.s32 4294967295, %s4358_s24   ;;  %s4358_s24 = sphi %s4412_s24, %s4780_s24   ;;  %s4354_s23 = sphi %s4410_s23, %s4779_s23   ;;  %s4350_s22 = sphi %s4408_s22, %s4778_s22   ;;  %s4346_s21 = sphi %s4406_s21, %s4777_s21  }
   0x6   : > { %s195_s26 = sshll.u32 %s4360_s25, 4  ;;  %p3125_p0 = scmp.ge.s32.totalorder %s4358_s24, 1  ;;  %s4432_s26 = int_to_ptr.vmem [resolvable:$true] %s195_s26 }
   0x7   : > { %p4764_p1 = scmp.eq.s32.totalorder %s4427_s27, 0  ;;  %p183_p2 = scmp.lt.s32.totalorder %s4358_s24, 5 }
   0x8   : > { %s4361_s30 = smov [#allocation7]   ;;  %s4362_s8 = smov [#allocation6]  }
   0x9   : > { %p4434_p3 = pnand %p3125_p0, %p183_p2  ;;  %s221_s7 = sshll.u32 %s4361_s30, 4  ;;  %s4446_s7 = int_to_ptr.vmem [resolvable:$true] %s221_s7 }
   0xa   : > { %s4448_s9 = sshll.u32 %s4362_s8, 4  ;;  %s4174_s12 = scalar_lea.hbm %s4758_s1, 24576  ;;  %s209_s9 = int_to_ptr.vmem [resolvable:$true] %s4448_s9 }
   0xb   : > { %s4766_s28 = scalar_select %p4434_p3, 1, 0 }
   0xc   : > { %p3740_p4 = pneg %p4434_p3  ;;  %p4175_p6 = scmp.ne.s32.totalorder %s4758_s1, %s4174_s12 }
   0xd   : > { %p4181_p10 = scmp.lt.u32.totalorder %s4174_s12, %s4758_s1 }
   0xe   : > { %p4442_p5 = pnand %p3740_p4, %p4764_p1 }
  0x10   : > { %p4458_p7 = pneg %p4442_p5 }
  0x12   : > { %p4177_p8 = pnand %p4458_p7, %p4175_p6 }
  0x14   : > { %p4178_p9 = pneg %p4177_p8 }
  0x16   : > { %p4183_p11 = pnand %p4181_p10, %p4178_p9 }
  0x18   : > { %4186 = shalt.err (!%p4183_p11)
}
  0x19   : > { %s4187_s18 = scalar_lea.vmem %s4432_s26, 24576  ;;  %p4195_p2 = scmp.lt.s32.totalorder %s4432_s26, %s4432_s26 }
  0x1a   : > { %p4188_p12 = scmp.ne.s32.totalorder %s4432_s26, %s4187_s18  ;;  %p4196_p4 = scmp.lt.s32.totalorder %s4187_s18, %s4187_s18 }
  0x1c   : > { %p4190_p13 = pnand %p4188_p12, %p4458_p7  ;;  %p4197_p6 = por %p4196_p4, %p4195_p2 }
  0x1e   : > { %p4191_p0 = pneg %p4190_p13 }
  0x20   : > { %p4198_p8 = pnand %p4197_p6, %p4191_p0 }
  0x22   : > { %4201 = shalt.err (!%p4198_p8)
}
  0x23   : > { %s4363_s19 = smov 192   ;;  %s4364_s20 = smov 12  }
  0x24   : > { %3743 = dma.hbm_to_vmem [thread:$0]  (!%p4442_p5), %s4758_s1, 24576, %s4432_s26, [#allocation5], %s4363_s19, %s4363_s19, %s4364_s20  }
  0x25   : > { %s4202_s11 = scalar_lea.hbm %s4760_s3, 2048 }
  0x26   : > { %p4203_p9 = scmp.ne.s32.totalorder %s4760_s3, %s4202_s11  ;;  %p4209_p12 = scmp.lt.u32.totalorder %s4202_s11, %s4760_s3 }
  0x28   : > { %p4205_p10 = pnand %p4203_p9, %p4458_p7 }
  0x2a   : > { %p4206_p11 = pneg %p4205_p10 }
  0x2c   : > { %p4211_p13 = pnand %p4209_p12, %p4206_p11 }
  0x2e   : > { %4214 = shalt.err (!%p4211_p13)
}
  0x2f   : > { %s4215_s26 = scalar_lea.vmem %s4446_s7, 2048  ;;  %p4223_p6 = scmp.lt.s32.totalorder %s4446_s7, %s4446_s7 }
  0x30   : > { %p4216_p0 = scmp.ne.s32.totalorder %s4446_s7, %s4215_s26  ;;  %p4224_p8 = scmp.lt.s32.totalorder %s4215_s26, %s4215_s26 }
  0x32   : > { %p4218_p2 = pnand %p4216_p0, %p4458_p7  ;;  %p4225_p9 = por %p4224_p8, %p4223_p6 }
  0x34   : > { %p4219_p4 = pneg %p4218_p2 }
  0x36   : > { %p4226_p10 = pnand %p4225_p9, %p4219_p4 }
  0x38   : > { %4229 = shalt.err (!%p4226_p10)
}
  0x39   : > { %s4365_s17 = smov 64   ;;  %s4366_s18 = smov 4  }
  0x3a   : > { %3749 = dma.hbm_to_vmem [thread:$0]  (!%p4442_p5), %s4760_s3, 2048, %s4446_s7, [#allocation8], %s4365_s17, %s4365_s17, %s4366_s18  }
  0x3b   : > { %s4230_s8 = scalar_lea.hbm %s4759_s2, 6144 }
  0x3c   : > { %p4231_p11 = scmp.ne.s32.totalorder %s4759_s2, %s4230_s8  ;;  %p4237_p0 = scmp.lt.u32.totalorder %s4230_s8, %s4759_s2 }
  0x3e   : > { %p4233_p12 = pnand %p4231_p11, %p4458_p7 }
  0x40   : > { %p4234_p13 = pneg %p4233_p12 }
  0x42   : > { %p4239_p2 = pnand %p4237_p0, %p4234_p13 }
  0x44   : > { %4242 = shalt.err (!%p4239_p2)
}
  0x45   : > { %s4243_s14 = scalar_lea.vmem %s209_s9, 6144  ;;  %p4251_p9 = scmp.lt.s32.totalorder %s209_s9, %s209_s9 }
  0x46   : > { %p4244_p4 = scmp.ne.s32.totalorder %s209_s9, %s4243_s14  ;;  %p4252_p10 = scmp.lt.s32.totalorder %s4243_s14, %s4243_s14 }
  0x48   : > { %p4246_p6 = pnand %p4244_p4, %p4458_p7  ;;  %p4253_p1 = por %p4252_p10, %p4251_p9 }
  0x4a   : > { %p4247_p8 = pneg %p4246_p6 }
  0x4c   : > { %p4254_p3 = pnand %p4253_p1, %p4247_p8 }
  0x4e   : > { %4257 = shalt.err (!%p4254_p3)
}
  0x4f   : > { %3746 = dma.hbm_to_vmem [thread:$0]  (!%p4442_p5), %s4759_s2, 6144, %s209_s9, [#allocation5], %s4365_s17, %s4365_s17, %s4366_s18  }
  0x50   : > { %s4367_s26 = smov [#allocation9]   ;;  %s4258_s30 = scalar_lea.hbm %s4761_s4, 384 }
  0x51   : > { %s235_s19 = sshll.u32 %s4367_s26, 4  ;;  %p4259_p11 = scmp.ne.s32.totalorder %s4761_s4, %s4258_s30  ;;  %s236_s19 = int_to_ptr.vmem [resolvable:$true] %s235_s19 }
  0x52   : > { %p4265_p12 = scmp.lt.u32.totalorder %s4258_s30, %s4761_s4 }
  0x53   : > { %p4261_p1 = pnand %p4259_p11, %p4458_p7 }
  0x55   : > { %p4262_p3 = pneg %p4261_p1 }
  0x57   : > { %p4267_p13 = pnand %p4265_p12, %p4262_p3 }
  0x59   : > { %4270 = shalt.err (!%p4267_p13)
}
  0x5a   : > { %s4271_s9 = scalar_lea.vmem %s236_s19, 384  ;;  %p4279_p6 = scmp.lt.s32.totalorder %s236_s19, %s236_s19 }
  0x5b   : > { %p4272_p0 = scmp.ne.s32.totalorder %s236_s19, %s4271_s9  ;;  %p4280_p8 = scmp.lt.s32.totalorder %s4271_s9, %s4271_s9 }
  0x5d   : > { %p4274_p2 = pnand %p4272_p0, %p4458_p7  ;;  %p4281_p9 = por %p4280_p8, %p4279_p6 }
  0x5f   : > { %p4275_p4 = pneg %p4274_p2 }
  0x61   : > { %p4282_p10 = pnand %p4281_p9, %p4275_p4 }
  0x63   : > { %4285 = shalt.err (!%p4282_p10)
}
  0x64   : > { %3752 = dma.hbm_to_vmem [thread:$0]  (!%p4442_p5), %s4761_s4, 384, %s236_s19, [#allocation8]  }
  0x65   : > { %s4540_s15 = sadd.s32 1, %s4358_s24   ;;  %s28_s29 = sadd.s32 1, %s4354_s23 }
  0x66   : > { %s25_s13 = ssub.s32 %s4358_s24, %s4540_s15  ;;  %p35_p7 = scmp.ne.s32.totalorder %s4354_s23, %s4350_s22 }
  0x67   : > { %p26_p11 = scmp.eq.s32.totalorder %s25_s13, 0  ;;  %p36_p1 = scmp.eq.s32.totalorder %s4358_s24, 0 }
  0x68   : > { %p41_p3 = scmp.ne.s32.totalorder %s4350_s22, %s4346_s21  ;;  %p3761_p12 = scmp.lt.s32.totalorder %s4358_s24, 4 }
  0x69   : > { %s4552_s14 = scalar_select %p26_p11, %s4354_s23, %s28_s29  }
  0x6a   : > { %p37_p13 = por %p36_p1, %p35_p7  ;;  %p4769_p0 = scmp.eq.s32.totalorder %s4427_s27, 0 }
  0x6b   : > { %s249_s16 = sand.u32 1, %s4354_s23   ;;  %s3408_s26 = sshll.u32 %s4358_s24, 10 }
  0x6c   : > { %p4556_p2 = por %p4769_p0, %p41_p3  ;;  %s3131_s19 = sshll.u32 %s249_s16, 6 }
  0x6d   : > { %s4565_s30 = scalar_lea.hbm %s4757_s0, %s3408_s26  ;;  %s253_s21 = scalar_lea.vmem [#allocation2], %s3131_s19 }
  0x6e   : > { %s261_s8 = sshll.u32 %s253_s21, 4  ;;  %p4567_p5 = pnand %p3761_p12, %p37_p13  ;;  %s4571_s8 = int_to_ptr.vmem [resolvable:$true] %s261_s8 }
  0x6f   : > { %s250_s24 = scalar_lea.sflag [#allocation3], %s249_s16  ;;  %s4286_s11 = scalar_lea.hbm %s4565_s30, 1024 }
  0x70   : > { %p4287_p4 = scmp.ne.s32.totalorder %s4565_s30, %s4286_s11  ;;  %p4288_p6 = pneg %p4567_p5 }
  0x71   : > { %s4291_s17 = scalar_lea.hbm %s4757_s0, 4096  ;;  %p4292_p10 = scmp.lt.u32.totalorder %s4565_s30, %s4757_s0 }
  0x72   : > { %p4289_p8 = pnand %p4288_p6, %p4287_p4  ;;  %p4293_p7 = scmp.lt.u32.totalorder %s4291_s17, %s4286_s11 }
  0x73   : > { %p4295_p1 = scmp.lt.u32.totalorder %s4286_s11, %s4565_s30 }
  0x74   : > { %p4290_p9 = pneg %p4289_p8  ;;  %p4294_p11 = por %p4293_p7, %p4292_p10 }
  0x76   : > { %p4296_p3 = por %p4295_p1, %p4294_p11 }
  0x78   : > { %p4297_p12 = pnand %p4296_p3, %p4290_p9 }
  0x7a   : > { %4300 = shalt.err (!%p4297_p12)
}
  0x7b   : > { %s4301_s13 = scalar_lea.vmem %s4571_s8, 1024  ;;  %s4368_s16 = smov [#allocation2]  }
  0x7c   : > { %p4302_p13 = scmp.ne.s32.totalorder %s4571_s8, %s4301_s13  ;;  %s4306_s26 = sshll.u32 %s4368_s16, 4  ;;  %s4307_s26 = int_to_ptr.vmem [resolvable:$false] %s4306_s26 }
  0x7d   : > { %s4308_s19 = scalar_lea.vmem %s4307_s26, 2048  ;;  %p4309_p8 = scmp.lt.s32.totalorder %s4571_s8, %s4307_s26 }
  0x7e   : > { %p4304_p0 = pnand %p4302_p13, %p4288_p6  ;;  %p4310_p10 = scmp.lt.s32.totalorder %s4308_s19, %s4301_s13 }
  0x80   : > { %p4305_p4 = pneg %p4304_p0  ;;  %p4311_p7 = por %p4310_p10, %p4309_p8 }
  0x82   : > { %p4312_p11 = pnand %p4311_p7, %p4305_p4 }
  0x84   : > { %4315 = shalt.err (!%p4312_p11)
}
  0x85   : > { %3756 = dma.hbm_to_vmem [thread:$0]  (!%p4567_p5), %s4565_s30, 1024, %s4571_s8, %s250_s24  }
  0x86   : > { %p4772_p9 = scmp.ne.s32.totalorder %s4766_s28, 0 }
  0x87   : > { %s272_s20 = sand.u32 (!%p4772_p9), 1, %s4350_s22  }
  0x88   : > { %270 = sbr.rel (%p4772_p9) target bundleno = 3202 (0xc82), region = 44  ;;  %s3135_s25 = sshll.u32 (!%p4772_p9), %s272_s20, 6 }
  0x89   : > { %s273_s21 = scalar_lea.sflag (!%p4772_p9), [#allocation3], %s272_s20  ;;  %s4601_s11 = scalar_lea.vmem (!%p4772_p9), [#allocation2], %s3135_s25 }
  0x8f   : > { %4333 = dma.done.wait (%p4556_p2), %s273_s21, 1024  }
  0x90   : > { %4335 = vsyncadd (%p4556_p2), %s273_s21, 4294966272  ;;  %p4773_p6 = scmp.eq.s32.totalorder %s4427_s27, 0 }
  0x92   : > { %4337 = dma.done.wait (%p4773_p6), [#allocation5], 30720   ;;  %p4774_p5 = pmov %p4773_p6 }
  0x94   : > { %4339 = vsyncadd (%p4774_p5), [#allocation5], 4294936576  ;;  %p4775_p1 = pmov %p4774_p5 }
  0x96   : > { %4341 = dma.done.wait (%p4775_p1), [#allocation8], 2432   ;;  %p4776_p3 = pmov %p4775_p1 }
  0x97   : > { %v3808_v0 = vld [vmem:[#allocation4 + $0x4] ss:$12 sps:$4 sm:$0xff]   ;;  %v3810_v1 = vld [vmem:[#allocation4] ss:$12 sps:$4 sm:$0xff]   ;;  %v3811_v2 = vld [vmem:[#allocation4 + $0x1c] ss:$12 sps:$4 sm:$0xff]  }
  0x98   : > { %4343 = vsyncadd (%p4776_p3), [#allocation8], 4294964864  ;;  %1638 = vmatprep.subr.bf16.mxu0 %v3808_v0  ;;  %v3813_v3 = vld [vmem:[#allocation4 + $0x18] ss:$12 sps:$4 sm:$0xff]   ;;  %v3814_v4 = vld [vmem:[#allocation4 + $0x34] ss:$12 sps:$4 sm:$0xff]  }
  0x99   : > { %1639 = vmatpush1.bf16.msra.mxu0 %v3810_v1  ;;  %v3816_v5 = vld [vmem:[#allocation4 + $0x30] ss:$12 sps:$4 sm:$0xff]   ;;  %v3817_v6 = vld [vmem:[#allocation4 + $0x4c] ss:$12 sps:$4 sm:$0xff]   ;;  %v3819_v7 = vld [vmem:[#allocation4 + $0x48] ss:$12 sps:$4 sm:$0xff]  }
  0x9a   : > { %1640 = vmatprep.subr.bf16.mxu0 %v3811_v2  ;;  %v3820_v8 = vld [vmem:[#allocation4 + $0x64] ss:$12 sps:$4 sm:$0xff]   ;;  %v3822_v9 = vld [vmem:[#allocation4 + $0x60] ss:$12 sps:$4 sm:$0xff]   ;;  %v3838_v10 = vld [vmem:[#allocation4 + $0xc8] ss:$12 sps:$4 sm:$0xff]  }
  0x9b   : > { %v3839_v11 = vld [vmem:[#allocation4 + $0x8] ss:$12 sps:$4 sm:$0xff]   ;;  %3409 = vmatprep.subr.bf16.mxu1 %v3838_v10  ;;  %v3843_v13 = vld [vmem:[#allocation4 + $0xe0] ss:$12 sps:$4 sm:$0xff]   ;;  %v3825_v15 = vld [vmem:[#allocation4 + $0x78] ss:$12 sps:$4 sm:$0xff]  }
  0x9c   : > { %v3823_v12 = vld [vmem:[#allocation4 + $0x7c] ss:$12 sps:$4 sm:$0xff]   ;;  %3410 = vmatpush3.bf16.msra.mxu1 %v3839_v11  ;;  %v3844_v14 = vld [vmem:[#allocation4 + $0x20] ss:$12 sps:$4 sm:$0xff]   ;;  %v3848_v17 = vld [vmem:[#allocation4 + $0xf8] ss:$12 sps:$4 sm:$0xff]  }
  0x9d   : > { %1641 = vmatpush1.bf16.msra.mxu0 %v3813_v3  ;;  %v3826_v16 = vld [vmem:[#allocation4 + $0x94] ss:$12 sps:$4 sm:$0xff]   ;;  %3411 = vmatprep.subr.bf16.mxu1 %v3843_v13  ;;  %v3849_v18 = vld [vmem:[#allocation4 + $0x38] ss:$12 sps:$4 sm:$0xff]   ;;  %v3828_v19 = vld [vmem:[#allocation4 + $0x90] ss:$12 sps:$4 sm:$0xff]  }
  0x9e   : > { %1642 = vmatprep.subr.bf16.mxu0 %v3814_v4  ;;  %v3829_v20 = vld [vmem:[#allocation4 + $0xac] ss:$12 sps:$4 sm:$0xff]   ;;  %v3853_v21 = vld [vmem:[#allocation4 + $0x110] ss:$12 sps:$4 sm:$0xff]   ;;  %v3831_v23 = vld [vmem:[#allocation4 + $0xa8] ss:$12 sps:$4 sm:$0xff]  }
  0x9f   : > { %v3854_v22 = vld [vmem:[#allocation4 + $0x50] ss:$12 sps:$4 sm:$0xff]   ;;  %v3858_v24 = vld [vmem:[#allocation4 + $0x128] ss:$12 sps:$4 sm:$0xff]   ;;  %v3863_v27 = vld [vmem:[#allocation4 + $0x140] ss:$12 sps:$4 sm:$0xff]  }
  0xa0   : > { %3412 = vmatpush3.bf16.msra.mxu1 %v3844_v14  ;;  %v3832_v25 = vld [vmem:[#allocation4 + $0xc4] ss:$12 sps:$4 sm:$0xff]   ;;  %v3859_v26 = vld [vmem:[#allocation4 + $0x68] ss:$12 sps:$4 sm:$0xff]   ;;  %v3834_v28 = vld [vmem:[#allocation4 + $0xc0] ss:$12 sps:$4 sm:$0xff]  }
  0xa1   : > { %1643 = vmatpush1.bf16.msra.mxu0 %v3816_v5  ;;  %3413 = vmatprep.subr.bf16.mxu1 %v3848_v17  ;;  %v3835_v29 = vld [vmem:[#allocation4 + $0xdc] ss:$12 sps:$4 sm:$0xff]   ;;  %v3864_v30 = vld [vmem:[#allocation4 + $0x80] ss:$12 sps:$4 sm:$0xff]   ;;  %v3868_v31 = vld [vmem:[#allocation4 + $0x158] ss:$12 sps:$4 sm:$0xff]  }
  0xa2   : > { %1644 = vmatprep.subr.bf16.mxu0 %v3817_v6  ;;  %v3837_v32 = vld [vmem:[#allocation4 + $0xd8] ss:$12 sps:$4 sm:$0xff]   ;;  %v326_v33 = vld [vmem:[%s4601_s11 + $0x8] sm:$0xff]  ;;  %v3840_v34 = vld [vmem:[#allocation4 + $0xf4] ss:$12 sps:$4 sm:$0xff]   ;;  %vm4370_vm0 = vmmov 0  }
  0xa3   : > { %v334_v35 = vpack.c.bf16 %v326_v33, %v326_v33  ;;  %v3869_v36 = vld [vmem:[#allocation4 + $0x98] ss:$12 sps:$4 sm:$0xff]   ;;  %v3873_v37 = vld [vmem:[#allocation4 + $0x170] ss:$12 sps:$4 sm:$0xff]   ;;  %v3878_v41 = vld [vmem:[#allocation4 + $0x248] ss:$12 sps:$4 sm:$0xff]  }
  0xa4   : > { %3414 = vmatpush3.bf16.msra.mxu1 %v3849_v18  ;;  %v3842_v38 = vld [vmem:[#allocation4 + $0xf0] ss:$12 sps:$4 sm:$0xff]   ;;  %v3845_v39 = vld [vmem:[#allocation4 + $0x10c] ss:$12 sps:$4 sm:$0xff]   ;;  %v3847_v42 = vld [vmem:[#allocation4 + $0x108] ss:$12 sps:$4 sm:$0xff]  }
  0xa5   : > { %1645 = vmatpush1.bf16.msra.mxu0 %v3819_v7  ;;  %3415 = vmatprep.subr.bf16.mxu1 %v3853_v21  ;;  %v3874_v40 = vld [vmem:[#allocation4 + $0xb0] ss:$12 sps:$4 sm:$0xff]   ;;  %v325_v43 = vld [vmem:[%s4601_s11] sm:$0xff]  ;;  %v3879_v45 = vld [vmem:[#allocation4 + $0x188] ss:$12 sps:$4 sm:$0xff]   ;;  %vm2715_vm1 = vcmask 261120  }
  0xa6   : > { %1646 = vmatprep.subr.bf16.mxu0 %v3820_v8  ;;  %1670 = vmatprep.mubr.bf16.mxu0 %v334_v35  ;;  %v3850_v44 = vld [vmem:[#allocation4 + $0x124] ss:$12 sps:$4 sm:$0xff]   ;;  %v333_v46 = vpack.c.bf16 %v325_v43, %v325_v43  ;;  %v3883_v47 = vld [vmem:[#allocation4 + $0x260] ss:$12 sps:$4 sm:$0xff]   ;;  %v3855_v49 = vld [vmem:[#allocation4 + $0x13c] ss:$12 sps:$4 sm:$0xff]  }
  0xa7   : > { %1834 = vmatprep.mubr.bf16.mxu1 %v334_v35  ;;  %v3852_v48 = vld [vmem:[#allocation4 + $0x120] ss:$12 sps:$4 sm:$0xff]   ;;  %v3888_v51 = vld [vmem:[#allocation4 + $0x278] ss:$12 sps:$4 sm:$0xff]   ;;  %v3893_v55 = vld [vmem:[#allocation4 + $0x290] ss:$12 sps:$4 sm:$0xff]  }
  0xa8   : > { %3416 = vmatpush3.bf16.msra.mxu1 %v3854_v22  ;;  %v3884_v50 = vld [vmem:[#allocation4 + $0x1a0] ss:$12 sps:$4 sm:$0xff]   ;;  %v3857_v52 = vld [vmem:[#allocation4 + $0x138] ss:$12 sps:$4 sm:$0xff]   ;;  %v3862_v56 = vld [vmem:[#allocation4 + $0x150] ss:$12 sps:$4 sm:$0xff]  }
  0xa9   : > { %1647 = vmatpush1.bf16.msra.mxu0 %v3822_v9  ;;  %3417 = vmatprep.subr.bf16.mxu1 %v3858_v24  ;;  %v3860_v53 = vld [vmem:[#allocation4 + $0x154] ss:$12 sps:$4 sm:$0xff]   ;;  %v3889_v54 = vld [vmem:[#allocation4 + $0x1b8] ss:$12 sps:$4 sm:$0xff]   ;;  %v3894_v58 = vld [vmem:[#allocation4 + $0x1d0] ss:$12 sps:$4 sm:$0xff]  }
  0xaa   : > { %1648 = vmatprep.subr.bf16.mxu0 %v3823_v12  ;;  %v3865_v57 = vld [vmem:[#allocation4 + $0x16c] ss:$12 sps:$4 sm:$0xff]   ;;  %v3898_v59 = vld [vmem:[#allocation4 + $0x2a8] ss:$12 sps:$4 sm:$0xff]   ;;  %v3872_v61 = vld [vmem:[#allocation4 + $0x184] ss:$12 sps:$4 sm:$0xff]  }
  0xab   : > { %v3867_v60 = vld [vmem:[#allocation4 + $0x168] ss:$12 sps:$4 sm:$0xff]   ;;  %v3903_v63 = vld [vmem:[#allocation4 + $0x2c0] ss:$12 sps:$4 sm:$0xff]   ;;  %v3908_v3 = vld [vmem:[#allocation4 + $0x2d8] ss:$12 sps:$4 sm:$0xff]  }
  0xac   : > { %3418 = vmatpush3.bf16.msra.mxu1 %v3859_v26  ;;  %v3899_v62 = vld [vmem:[#allocation4 + $0x1e8] ss:$12 sps:$4 sm:$0xff]   ;;  %v3870_v0 = vld [vmem:[#allocation4 + $0x180] ss:$12 sps:$4 sm:$0xff]   ;;  %v3875_v4 = vld [vmem:[#allocation4 + $0x198] ss:$12 sps:$4 sm:$0xff]  }
  0xad   : > { %1649 = vmatpush1.bf16.msra.mxu0 %v3825_v15  ;;  %3419 = vmatprep.subr.bf16.mxu1 %v3863_v27  ;;  %v3877_v1 = vld [vmem:[#allocation4 + $0x19c] ss:$12 sps:$4 sm:$0xff]   ;;  %v3904_v2 = vld [vmem:[#allocation4 + $0x200] ss:$12 sps:$4 sm:$0xff]   ;;  %v3909_v9 = vld [vmem:[#allocation4 + $0x218] ss:$12 sps:$4 sm:$0xff]  }
  0xae   : > { %1650 = vmatprep.subr.bf16.mxu0 %v3826_v16  ;;  %v328_v5 = vld [vmem:[%s4601_s11 + $0x18] sm:$0xff]  ;;  %v3882_v6 = vld [vmem:[#allocation4 + $0x1b4] ss:$12 sps:$4 sm:$0xff]   ;;  %v3892_v16 = vld [vmem:[#allocation4 + $0x1e4] ss:$12 sps:$4 sm:$0xff]   ;;  %p320_p2 = scmp.lt.s32.totalorder %s4427_s27, 3 }
  0xaf   : > { %v336_v7 = vpack.c.bf16 %v328_v5, %v328_v5  ;;  %v3880_v8 = vld [vmem:[#allocation4 + $0x1b0] ss:$12 sps:$4 sm:$0xff]   ;;  %v3887_v11 = vld [vmem:[#allocation4 + $0x1cc] ss:$12 sps:$4 sm:$0xff]   ;;  %v3918_v14 = vld [vmem:[#allocation4 + $0x3c8] ss:$12 sps:$4 sm:$0xff]  }
  0xb0   : > { %3420 = vmatpush3.bf16.msra.mxu1 %v3864_v30  ;;  %v3913_v10 = vld [vmem:[#allocation4 + $0x2f0] ss:$12 sps:$4 sm:$0xff]   ;;  %v3885_v15 = vld [vmem:[#allocation4 + $0x1c8] ss:$12 sps:$4 sm:$0xff]   ;;  %v3924_v22 = vld [vmem:[#allocation4 + $0x320] ss:$12 sps:$4 sm:$0xff]  }
  0xb1   : > { %1651 = vmatpush1.bf16.msra.mxu0 %v3828_v19  ;;  %3421 = vmatprep.subr.bf16.mxu1 %v3868_v31  ;;  %v3914_v12 = vld [vmem:[#allocation4 + $0x230] ss:$12 sps:$4 sm:$0xff]   ;;  %v3919_v18 = vld [vmem:[#allocation4 + $0x308] ss:$12 sps:$4 sm:$0xff]   ;;  %v3923_v19 = vld [vmem:[#allocation4 + $0x3e0] ss:$12 sps:$4 sm:$0xff]  }
  0xb2   : > { %1652 = vmatprep.subr.bf16.mxu0 %v3829_v20  ;;  %v327_v13 = vld [vmem:[%s4601_s11 + $0x10] sm:$0xff]  ;;  %v3890_v20 = vld [vmem:[#allocation4 + $0x1e0] ss:$12 sps:$4 sm:$0xff]   ;;  %v3897_v21 = vld [vmem:[#allocation4 + $0x1fc] ss:$12 sps:$4 sm:$0xff]   ;;  %s4782_s27 = smov (!%p320_p2, %s4427_s27), 3 }
  0xb3   : > { %v4619_v17 = vpack.c.bf16 %v327_v13, %v327_v13  ;;  %v3895_v24 = vld [vmem:[#allocation4 + $0x1f8] ss:$12 sps:$4 sm:$0xff]   ;;  %v3933_v27 = vld [vmem:[#allocation4 + $0x410] ss:$12 sps:$4 sm:$0xff]   ;;  %v3938_v31 = vld [vmem:[#allocation4 + $0x428] ss:$12 sps:$4 sm:$0xff]  }
  0xb4   : > { %3422 = vmatpush3.bf16.msra.mxu1 %v3869_v36  ;;  %v3929_v26 = vld [vmem:[#allocation4 + $0x338] ss:$12 sps:$4 sm:$0xff]   ;;  %v3934_v30 = vld [vmem:[#allocation4 + $0x350] ss:$12 sps:$4 sm:$0xff]   ;;  %v3943_v35 = vld [vmem:[#allocation4 + $0x440] ss:$12 sps:$4 sm:$0xff]  }
  0xb5   : > { %1653 = vmatpush1.bf16.msra.mxu0 %v3831_v23  ;;  %3423 = vmatprep.subr.bf16.mxu1 %v3873_v37  ;;  %v3928_v23 = vld [vmem:[#allocation4 + $0x3f8] ss:$12 sps:$4 sm:$0xff]   ;;  %v330_v36 = vld [vmem:[%s4601_s11 + $0x28] sm:$0xff]  ;;  %v3922_v43 = vld [vmem:[#allocation4 + $0x274] ss:$12 sps:$4 sm:$0xff]   ;;  %s3140_s17 = sshll.u32 %s4782_s27, 3 }
  0xb6   : > { %1654 = vmatprep.subr.bf16.mxu0 %v3832_v25  ;;  %v3902_v25 = vld [vmem:[#allocation4 + $0x214] ss:$12 sps:$4 sm:$0xff]   ;;  %v3912_v33 = vld [vmem:[#allocation4 + $0x244] ss:$12 sps:$4 sm:$0xff]   ;;  %s323_s26 = scalar_lea.vmem %s4763_s6, %s3140_s17 }
  0xb7   : > { %v3910_v37 = vld [vmem:[#allocation4 + $0x240] ss:$12 sps:$4 sm:$0xff]   ;;  %v3945_v5 = vld [vmem:[#allocation4 + $0x2e8] ss:$12 sps:$4 sm:$0xff]   ;;  %v3988_v13 = vld [vmem:[#allocation4 + $0x5d8] ss:$12 sps:$4 sm:$0xff]  }
  0xb8   : > { %3424 = vmatpush3.bf16.msra.mxu1 %v3874_v40  ;;  %v3944_v40 = vld [vmem:[#allocation4 + $0x380] ss:$12 sps:$4 sm:$0xff]  }
  0xb9   : > { %1655 = vmatpush1.bf16.msra.mxu0 %v3834_v28  ;;  %3431 = vmatprep.subr.bf16.mxu1 %v3878_v41  ;;  %v3900_v28 = vld [vmem:[#allocation4 + $0x210] ss:$12 sps:$4 sm:$0xff]   ;;  %v3948_v41 = vld [vmem:[#allocation4 + $0x458] ss:$12 sps:$4 sm:$0xff]  }
  0xba   : > { %1656 = vmatprep.subr.bf16.mxu0 %v3835_v29  ;;  %v3907_v29 = vld [vmem:[#allocation4 + $0x22c] ss:$12 sps:$4 sm:$0xff]  }
  0xbb   : > { %1835 = vmatmul.mubr.bf16.vlgmr.msra.gmra.mrb[0].mxu1 %v333_v46 }
  0xbc   : > { %3432 = vmatpush3.bf16.msra.mxu1 %v3879_v45  ;;  %1874 = vmatprep.mubr.bf16.mxu1 %v336_v7  ;;  %v3949_v45 = vld [vmem:[#allocation4 + $0x398] ss:$12 sps:$4 sm:$0xff]  }
  0xbd   : > { %1657 = vmatpush1.bf16.msra.mxu0 %v3837_v32  ;;  %3433 = vmatprep.subr.bf16.mxu1 %v3883_v47  ;;  %v3905_v32 = vld [vmem:[#allocation4 + $0x228] ss:$12 sps:$4 sm:$0xff]   ;;  %v3927_v47 = vld [vmem:[#allocation4 + $0x28c] ss:$12 sps:$4 sm:$0xff]  }
  0xbe   : > { %1658 = vmatprep.subr.bf16.mxu0 %v3840_v34  ;;  %v3939_v34 = vld [vmem:[#allocation4 + $0x368] ss:$12 sps:$4 sm:$0xff]  }
  0xc0   : > { %3434 = vmatpush3.bf16.msra.mxu1 %v3884_v50  ;;  %v3958_v50 = vld [vmem:[#allocation4 + $0x548] ss:$12 sps:$4 sm:$0xff]  }
  0xc1   : > { %1659 = vmatpush1.bf16.msra.mxu0 %v3842_v38  ;;  %3435 = vmatprep.subr.bf16.mxu1 %v3888_v51  ;;  %v4623_v38 = vpack.c.bf16 %v330_v36, %v330_v36  ;;  %v3925_v51 = vld [vmem:[#allocation4 + $0x288] ss:$12 sps:$4 sm:$0xff]  }
  0xc2   : > { %1660 = vmatprep.subr.bf16.mxu0 %v3845_v39  ;;  %v3917_v39 = vld [vmem:[#allocation4 + $0x25c] ss:$12 sps:$4 sm:$0xff]   ;;  %v4000_v36 = vld [vmem:[#allocation4 + $0x3f4] ss:$12 sps:$4 sm:$0xff]  }
  0xc4   : > { %3436 = vmatpush3.bf16.msra.mxu1 %v3889_v54  ;;  %v3959_v54 = vld [vmem:[#allocation4 + $0x488] ss:$12 sps:$4 sm:$0xff]  }
  0xc5   : > { %1661 = vmatpush1.bf16.msra.mxu0 %v3847_v42  ;;  %3437 = vmatprep.subr.bf16.mxu1 %v3893_v55  ;;  %v3915_v42 = vld [vmem:[#allocation4 + $0x258] ss:$12 sps:$4 sm:$0xff]   ;;  %v3963_v55 = vld [vmem:[#allocation4 + $0x560] ss:$12 sps:$4 sm:$0xff]  }
  0xc6   : > { %1662 = vmatprep.subr.bf16.mxu0 %v3850_v44  ;;  %v3920_v44 = vld [vmem:[#allocation4 + $0x270] ss:$12 sps:$4 sm:$0xff]  }
  0xc8   : > { %3438 = vmatpush3.bf16.msra.mxu1 %v3894_v58  ;;  %v3964_v58 = vld [vmem:[#allocation4 + $0x4a0] ss:$12 sps:$4 sm:$0xff]  }
  0xc9   : > { %1663 = vmatpush1.bf16.msra.mxu0 %v3852_v48  ;;  %3439 = vmatprep.subr.bf16.mxu1 %v3898_v59  ;;  %v3954_v48 = vld [vmem:[#allocation4 + $0x3b0] ss:$12 sps:$4 sm:$0xff]   ;;  %v3968_v59 = vld [vmem:[#allocation4 + $0x578] ss:$12 sps:$4 sm:$0xff]  }
  0xca   : > { %1664 = vmatprep.subr.bf16.mxu0 %v3855_v49  ;;  %v329_v49 = vld [vmem:[%s4601_s11 + $0x20] sm:$0xff] }
  0xcc   : > { %3440 = vmatpush3.bf16.msra.mxu1 %v3899_v62  ;;  %v3969_v62 = vld [vmem:[#allocation4 + $0x4b8] ss:$12 sps:$4 sm:$0xff]  }
  0xcd   : > { %1665 = vmatpush1.bf16.msra.mxu0 %v3857_v52  ;;  %3441 = vmatprep.subr.bf16.mxu1 %v3903_v63  ;;  %v3932_v52 = vld [vmem:[#allocation4 + $0x2a4] ss:$12 sps:$4 sm:$0xff]  }
  0xce   : > { %1666 = vmatprep.subr.bf16.mxu0 %v3860_v53  ;;  %v4627_v53 = vpack.c.bf16 %v329_v49, %v329_v49  ;;  %v3973_v63 = vld [vmem:[#allocation4 + $0x590] ss:$12 sps:$4 sm:$0xff]   ;;  %v4016_v49 = vld [vmem:[#allocation4 + $0x480] ss:$12 sps:$4 sm:$0xff]  }
  0xd0   : > { %3442 = vmatpush3.bf16.msra.mxu1 %v3904_v2  ;;  %v3974_v2 = vld [vmem:[#allocation4 + $0x4d0] ss:$12 sps:$4 sm:$0xff]  }
  0xd1   : > { %1667 = vmatpush1.bf16.msra.mxu0 %v3862_v56  ;;  %3443 = vmatprep.subr.bf16.mxu1 %v3908_v3  ;;  %v3930_v56 = vld [vmem:[#allocation4 + $0x2a0] ss:$12 sps:$4 sm:$0xff]   ;;  %v3978_v3 = vld [vmem:[#allocation4 + $0x5a8] ss:$12 sps:$4 sm:$0xff]  }
  0xd2   : > { %1668 = vmatprep.subr.bf16.mxu0 %v3865_v57  ;;  %v3937_v57 = vld [vmem:[#allocation4 + $0x2bc] ss:$12 sps:$4 sm:$0xff]  }
  0xd4   : > { %3444 = vmatpush3.bf16.msra.mxu1 %v3909_v9  ;;  %v3983_v9 = vld [vmem:[#allocation4 + $0x5c0] ss:$12 sps:$4 sm:$0xff]  }
  0xd5   : > { %1669 = vmatpush1.bf16.msra.mxu0 %v3867_v60  ;;  %3445 = vmatprep.subr.bf16.mxu1 %v3913_v10  ;;  %v3935_v60 = vld [vmem:[#allocation4 + $0x2b8] ss:$12 sps:$4 sm:$0xff]   ;;  %v3950_v10 = vld [vmem:[#allocation4 + $0x300] ss:$12 sps:$4 sm:$0xff]  }
  0xd6   : > { %1679 = vmatprep.subr.bf16.mxu0 %v3872_v61  ;;  %v3942_v61 = vld [vmem:[#allocation4 + $0x2d4] ss:$12 sps:$4 sm:$0xff]  }
  0xd8   : > { %1671 = vmatmul.mubr.bf16.vlgmr.msra.gmra.mrb[0].mxu0 %v333_v46  ;;  %3446 = vmatpush3.bf16.msra.mxu1 %v3914_v12  ;;  %v3953_v46 = vld [vmem:[#allocation4 + $0x470] ss:$12 sps:$4 sm:$0xff]   ;;  %v3984_v12 = vld [vmem:[#allocation4 + $0x500] ss:$12 sps:$4 sm:$0xff]  }
  0xd9   : > { %1680 = vmatpush1.bf16.msra.mxu0 %v3870_v0  ;;  %1711 = vmatprep.mubr.bf16.mxu0 %v336_v7  ;;  %v3940_v0 = vld [vmem:[#allocation4 + $0x2d0] ss:$12 sps:$4 sm:$0xff]  }
  0xda   : > { %1681 = vmatprep.subr.bf16.mxu0 %v3877_v1  ;;  %3453 = vmatprep.subr.bf16.mxu1 %v3918_v14  ;;  %v3947_v1 = vld [vmem:[#allocation4 + $0x2ec] ss:$12 sps:$4 sm:$0xff]   ;;  %v3952_v7 = vld [vmem:[#allocation4 + $0x304] ss:$12 sps:$4 sm:$0xff]  }
  0xdb   : > { %1875 = vmatmul.mubr.bf16.vlgmr.msra.gmra.mrb[4].mxu1 %v4619_v17  ;;  %v3955_v14 = vld [vmem:[#allocation4 + $0x318] ss:$12 sps:$4 sm:$0xff]  }
  0xdc   : > { %3454 = vmatpush3.bf16.msra.mxu1 %v3919_v18  ;;  %1914 = vmatprep.mubr.bf16.mxu1 %v4623_v38  ;;  %v3993_v18 = vld [vmem:[#allocation4 + $0x5f0] ss:$12 sps:$4 sm:$0xff]  }
  0xdd   : > { %1682 = vmatpush1.bf16.msra.mxu0 %v3875_v4  ;;  %3455 = vmatprep.subr.bf16.mxu1 %v3923_v19  ;;  %v332_v4 = vld [vmem:[%s4601_s11 + $0x38] sm:$0xff] }
  0xde   : > { %1683 = vmatprep.subr.bf16.mxu0 %v3882_v6  ;;  %v4631_v6 = vpack.c.bf16 %v332_v4, %v332_v4  ;;  %v3960_v19 = vld [vmem:[#allocation4 + $0x330] ss:$12 sps:$4 sm:$0xff]   ;;  %v4048_v4 = vld [vmem:[#allocation4 + $0x574] ss:$12 sps:$4 sm:$0xff]  }
  0xe0   : > { %3456 = vmatpush3.bf16.msra.mxu1 %v3924_v22  ;;  %v3965_v22 = vld [vmem:[#allocation4 + $0x348] ss:$12 sps:$4 sm:$0xff]  }
  0xe1   : > { %1684 = vmatpush1.bf16.msra.mxu0 %v3880_v8  ;;  %3457 = vmatprep.subr.bf16.mxu1 %v3928_v23  ;;  %v3979_v8 = vld [vmem:[#allocation4 + $0x4e8] ss:$12 sps:$4 sm:$0xff]   ;;  %v3972_v23 = vld [vmem:[#allocation4 + $0x364] ss:$12 sps:$4 sm:$0xff]  }
  0xe2   : > { %1685 = vmatprep.subr.bf16.mxu0 %v3887_v11  ;;  %v3957_v11 = vld [vmem:[#allocation4 + $0x31c] ss:$12 sps:$4 sm:$0xff]  }
  0xe4   : > { %3458 = vmatpush3.bf16.msra.mxu1 %v3929_v26  ;;  %v3977_v26 = vld [vmem:[#allocation4 + $0x37c] ss:$12 sps:$4 sm:$0xff]  }
  0xe5   : > { %1686 = vmatpush1.bf16.msra.mxu0 %v3885_v15  ;;  %3459 = vmatprep.subr.bf16.mxu1 %v3933_v27  ;;  %v3962_v15 = vld [vmem:[#allocation4 + $0x334] ss:$12 sps:$4 sm:$0xff]   ;;  %v3975_v27 = vld [vmem:[#allocation4 + $0x378] ss:$12 sps:$4 sm:$0xff]  }
  0xe6   : > { %1687 = vmatprep.subr.bf16.mxu0 %v3892_v16  ;;  %v3989_v16 = vld [vmem:[#allocation4 + $0x518] ss:$12 sps:$4 sm:$0xff]  }
  0xe8   : > { %3460 = vmatpush3.bf16.msra.mxu1 %v3934_v30  ;;  %v3987_v30 = vld [vmem:[#allocation4 + $0x3ac] ss:$12 sps:$4 sm:$0xff]  }
  0xe9   : > { %1688 = vmatpush1.bf16.msra.mxu0 %v3890_v20  ;;  %3461 = vmatprep.subr.bf16.mxu1 %v3938_v31  ;;  %v3967_v20 = vld [vmem:[#allocation4 + $0x34c] ss:$12 sps:$4 sm:$0xff]   ;;  %v3985_v31 = vld [vmem:[#allocation4 + $0x3a8] ss:$12 sps:$4 sm:$0xff]  }
  0xea   : > { %1689 = vmatprep.subr.bf16.mxu0 %v3897_v21  ;;  %v3994_v21 = vld [vmem:[#allocation4 + $0x530] ss:$12 sps:$4 sm:$0xff]  }
  0xec   : > { %3462 = vmatpush3.bf16.msra.mxu1 %v3939_v34  ;;  %v3997_v34 = vld [vmem:[#allocation4 + $0x3dc] ss:$12 sps:$4 sm:$0xff]  }
  0xed   : > { %1690 = vmatpush1.bf16.msra.mxu0 %v3895_v24  ;;  %3463 = vmatprep.subr.bf16.mxu1 %v3943_v35  ;;  %v3995_v35 = vld [vmem:[#allocation4 + $0x3d8] ss:$12 sps:$4 sm:$0xff]  }
  0xee   : > { %1691 = vmatprep.subr.bf16.mxu0 %v3902_v25  ;;  %v3970_v25 = vld [vmem:[#allocation4 + $0x360] ss:$12 sps:$4 sm:$0xff]  }
  0xf0   : > { %3464 = vmatpush3.bf16.msra.mxu1 %v3944_v40  ;;  %v4006_v40 = vld [vmem:[#allocation4 + $0x424] ss:$12 sps:$4 sm:$0xff]  }
  0xf1   : > { %1692 = vmatpush1.bf16.msra.mxu0 %v3900_v28  ;;  %3465 = vmatprep.subr.bf16.mxu1 %v3948_v41  ;;  %v3982_v28 = vld [vmem:[#allocation4 + $0x394] ss:$12 sps:$4 sm:$0xff]  }
  0xf2   : > { %1693 = vmatprep.subr.bf16.mxu0 %v3907_v29  ;;  %v3980_v29 = vld [vmem:[#allocation4 + $0x390] ss:$12 sps:$4 sm:$0xff]   ;;  %v4004_v41 = vld [vmem:[#allocation4 + $0x420] ss:$12 sps:$4 sm:$0xff]  }
  0xf4   : > { %3466 = vmatpush3.bf16.msra.mxu1 %v3949_v45  ;;  %v4010_v45 = vld [vmem:[#allocation4 + $0x450] ss:$12 sps:$4 sm:$0xff]  }
  0xf5   : > { %1694 = vmatpush1.bf16.msra.mxu0 %v3905_v32  ;;  %3467 = vmatprep.subr.bf16.mxu1 %v3953_v46  ;;  %v3992_v32 = vld [vmem:[#allocation4 + $0x3c4] ss:$12 sps:$4 sm:$0xff]   ;;  %v4015_v46 = vld [vmem:[#allocation4 + $0x46c] ss:$12 sps:$4 sm:$0xff]  }
  0xf6   : > { %1695 = vmatprep.subr.bf16.mxu0 %v3912_v33  ;;  %v3990_v33 = vld [vmem:[#allocation4 + $0x3c0] ss:$12 sps:$4 sm:$0xff]  }
  0xf8   : > { %3468 = vmatpush3.bf16.msra.mxu1 %v3954_v48  ;;  %v4018_v48 = vld [vmem:[#allocation4 + $0x484] ss:$12 sps:$4 sm:$0xff]  }
  0xf9   : > { %1696 = vmatpush1.bf16.msra.mxu0 %v3910_v37  ;;  %3475 = vmatprep.subr.bf16.mxu1 %v3958_v50  ;;  %v3998_v37 = vld [vmem:[#allocation4 + $0x3f0] ss:$12 sps:$4 sm:$0xff]  }
  0xfa   : > { %1697 = vmatprep.subr.bf16.mxu0 %v3917_v39  ;;  %v4001_v39 = vld [vmem:[#allocation4 + $0x408] ss:$12 sps:$4 sm:$0xff]  }
  0xfb   : > { %1915 = vmatmul.mubr.bf16.vlgmr.msra.gmra.mrb[8].mxu1 %v4627_v53  ;;  %v4021_v50 = vld [vmem:[#allocation4 + $0x49c] ss:$12 sps:$4 sm:$0xff]  }
  0xfc   : > { %3476 = vmatpush3.bf16.msra.mxu1 %v3959_v54  ;;  %1954 = vmatprep.mubr.bf16.mxu1 %v4631_v6  ;;  %v4022_v54 = vld [vmem:[#allocation4 + $0x4b0] ss:$12 sps:$4 sm:$0xff]  }
  0xfd   : > { %1698 = vmatpush1.bf16.msra.mxu0 %v3915_v42  ;;  %3477 = vmatprep.subr.bf16.mxu1 %v3963_v55  ;;  %v4009_v42 = vld [vmem:[#allocation4 + $0x43c] ss:$12 sps:$4 sm:$0xff]   ;;  %v4027_v55 = vld [vmem:[#allocation4 + $0x4cc] ss:$12 sps:$4 sm:$0xff]  }
  0xfe   : > { %1699 = vmatprep.subr.bf16.mxu0 %v3922_v43  ;;  %v4007_v43 = vld [vmem:[#allocation4 + $0x438] ss:$12 sps:$4 sm:$0xff]  }
 0x100   : > { %3478 = vmatpush3.bf16.msra.mxu1 %v3964_v58  ;;  %v4028_v58 = vld [vmem:[#allocation4 + $0x4e0] ss:$12 sps:$4 sm:$0xff]  }
 0x101   : > { %1700 = vmatpush1.bf16.msra.mxu0 %v3920_v44  ;;  %3479 = vmatprep.subr.bf16.mxu1 %v3968_v59  ;;  %v4012_v44 = vld [vmem:[#allocation4 + $0x454] ss:$12 sps:$4 sm:$0xff]   ;;  %v4033_v59 = vld [vmem:[#allocation4 + $0x4fc] ss:$12 sps:$4 sm:$0xff]  }
 0x102   : > { %1701 = vmatprep.subr.bf16.mxu0 %v3927_v47  ;;  %v4013_v47 = vld [vmem:[#allocation4 + $0x468] ss:$12 sps:$4 sm:$0xff]  }
 0x104   : > { %3480 = vmatpush3.bf16.msra.mxu1 %v3969_v62  ;;  %v4039_v62 = vld [vmem:[#allocation4 + $0x52c] ss:$12 sps:$4 sm:$0xff]  }
 0x105   : > { %1702 = vmatpush1.bf16.msra.mxu0 %v3925_v51  ;;  %3481 = vmatprep.subr.bf16.mxu1 %v3973_v63  ;;  %v4019_v51 = vld [vmem:[#allocation4 + $0x498] ss:$12 sps:$4 sm:$0xff]   ;;  %v4037_v63 = vld [vmem:[#allocation4 + $0x528] ss:$12 sps:$4 sm:$0xff]  }
 0x106   : > { %1703 = vmatprep.subr.bf16.mxu0 %v3932_v52  ;;  %v4024_v52 = vld [vmem:[#allocation4 + $0x4b4] ss:$12 sps:$4 sm:$0xff]  }
 0x108   : > { %3482 = vmatpush3.bf16.msra.mxu1 %v3974_v2  ;;  %v4045_v2 = vld [vmem:[#allocation4 + $0x55c] ss:$12 sps:$4 sm:$0xff]  }
 0x109   : > { %1704 = vmatpush1.bf16.msra.mxu0 %v3930_v56  ;;  %3483 = vmatprep.subr.bf16.mxu1 %v3978_v3  ;;  %v4025_v56 = vld [vmem:[#allocation4 + $0x4c8] ss:$12 sps:$4 sm:$0xff]   ;;  %v4043_v3 = vld [vmem:[#allocation4 + $0x558] ss:$12 sps:$4 sm:$0xff]  }
 0x10a   : > { %1705 = vmatprep.subr.bf16.mxu0 %v3937_v57  ;;  %v4030_v57 = vld [vmem:[#allocation4 + $0x4e4] ss:$12 sps:$4 sm:$0xff]  }
 0x10c   : > { %3484 = vmatpush3.bf16.msra.mxu1 %v3979_v8  ;;  %v4054_v8 = vld [vmem:[#allocation4 + $0x5a4] ss:$12 sps:$4 sm:$0xff]  }
 0x10d   : > { %1706 = vmatpush1.bf16.msra.mxu0 %v3935_v60  ;;  %3485 = vmatprep.subr.bf16.mxu1 %v3983_v9  ;;  %v4036_v60 = vld [vmem:[#allocation4 + $0x514] ss:$12 sps:$4 sm:$0xff]  }
 0x10e   : > { %1707 = vmatprep.subr.bf16.mxu0 %v3942_v61  ;;  %v4034_v61 = vld [vmem:[#allocation4 + $0x510] ss:$12 sps:$4 sm:$0xff]   ;;  %v4052_v9 = vld [vmem:[#allocation4 + $0x5a0] ss:$12 sps:$4 sm:$0xff]  }
 0x110   : > { %3486 = vmatpush3.bf16.msra.mxu1 %v3984_v12  ;;  %v4060_v12 = vld [vmem:[#allocation4 + $0x5d4] ss:$12 sps:$4 sm:$0xff]  }
 0x111   : > { %1708 = vmatpush1.bf16.msra.mxu0 %v3940_v0  ;;  %3487 = vmatprep.subr.bf16.mxu1 %v3988_v13  ;;  %v4042_v0 = vld [vmem:[#allocation4 + $0x544] ss:$12 sps:$4 sm:$0xff]  }
 0x112   : > { %1709 = vmatprep.subr.bf16.mxu0 %v3947_v1  ;;  %v4040_v1 = vld [vmem:[#allocation4 + $0x540] ss:$12 sps:$4 sm:$0xff]   ;;  %v4058_v13 = vld [vmem:[#allocation4 + $0x5d0] ss:$12 sps:$4 sm:$0xff]  }
 0x114   : > { %3488 = vmatpush3.bf16.msra.mxu1 %v3989_v16 }
 0x115   : > { %1710 = vmatpush1.bf16.msra.mxu0 %v3945_v5  ;;  %3489 = vmatprep.subr.bf16.mxu1 %v3993_v18  ;;  %v4046_v5 = vld [vmem:[#allocation4 + $0x570] ss:$12 sps:$4 sm:$0xff]  }
 0x116   : > { %1720 = vmatprep.subr.bf16.mxu0 %v3952_v7  ;;  %v4049_v7 = vld [vmem:[#allocation4 + $0x588] ss:$12 sps:$4 sm:$0xff]  }
 0x118   : > { %1712 = vmatmul.mubr.bf16.vlgmr.msra.gmra.mrb[0].mxu0 %v4619_v17  ;;  %v331_v17 = vld [vmem:[%s4601_s11 + $0x30] sm:$0xff]  ;;  %3490 = vmatpush3.bf16.msra.mxu1 %v3994_v21 }
 0x119   : > { %1721 = vmatpush1.bf16.msra.mxu0 %v3950_v10  ;;  %1752 = vmatprep.mubr.bf16.mxu0 %v4623_v38  ;;  %v4637_v24 = vpack.c.bf16 %v331_v17, %v331_v17  ;;  %v4003_v38 = vld [vmem:[#allocation4 + $0x40c] ss:$12 sps:$4 sm:$0xff]   ;;  %v4057_v10 = vld [vmem:[#allocation4 + $0x5bc] ss:$12 sps:$4 sm:$0xff]   ;;  %v599_v17 = vlaneseq }
 0x11a   : > { %1722 = vmatprep.subr.bf16.mxu0 %v3957_v11  ;;  %v4055_v11 = vld [vmem:[#allocation4 + $0x5b8] ss:$12 sps:$4 sm:$0xff]  }
 0x11b   : > { %1955 = vmatmul.mubr.bf16.vlgmr.msra.gmra.mrb[12].mxu1 %v4637_v24 }
 0x11d   : > { %1723 = vmatpush1.bf16.msra.mxu0 %v3955_v14  ;;  %v4063_v14 = vld [vmem:[#allocation4 + $0x5ec] ss:$12 sps:$4 sm:$0xff]  }
 0x11e   : > { %1724 = vmatprep.subr.bf16.mxu0 %v3962_v15  ;;  %v4061_v15 = vld [vmem:[#allocation4 + $0x5e8] ss:$12 sps:$4 sm:$0xff]  }
 0x121   : > { %1725 = vmatpush1.bf16.msra.mxu0 %v3960_v19 }
 0x122   : > { %1726 = vmatprep.subr.bf16.mxu0 %v3967_v20 }
 0x125   : > { %1727 = vmatpush1.bf16.msra.mxu0 %v3965_v22  ;;  %v4643_v22 = vshrl.u32 %v599_v17, 7 }
 0x126   : > { %1728 = vmatprep.subr.bf16.mxu0 %v3972_v23 }
 0x127   : > { %v609_v23 = vsub.s32 2, %v4643_v22 }
 0x129   : > { %1729 = vmatpush1.bf16.msra.mxu0 %v3970_v25  ;;  %v597_v25 = vld [vmem:[#allocation9] ss:$8 sm:$0x7] }
 0x12a   : > { %1730 = vmatprep.subr.bf16.mxu0 %v3977_v26  ;;  %v610_v26 = vrot.slane %v597_v25, %v609_v23 }
 0x12d   : > { %1731 = vmatpush1.bf16.msra.mxu0 %v3975_v27 }
 0x12e   : > { %1732 = vmatprep.subr.bf16.mxu0 %v3982_v28 }
 0x131   : > { %1733 = vmatpush1.bf16.msra.mxu0 %v3980_v29 }
 0x132   : > { %1734 = vmatprep.subr.bf16.mxu0 %v3987_v30 }
 0x135   : > { %1735 = vmatpush1.bf16.msra.mxu0 %v3985_v31 }
 0x136   : > { %1736 = vmatprep.subr.bf16.mxu0 %v3992_v32 }
 0x139   : > { %1737 = vmatpush1.bf16.msra.mxu0 %v3990_v33 }
 0x13a   : > { %1738 = vmatprep.subr.bf16.mxu0 %v3997_v34 }
 0x13d   : > { %1739 = vmatpush1.bf16.msra.mxu0 %v3995_v35 }
 0x13e   : > { %1740 = vmatprep.subr.bf16.mxu0 %v4000_v36 }
 0x141   : > { %1741 = vmatpush1.bf16.msra.mxu0 %v3998_v37 }
 0x142   : > { %1742 = vmatprep.subr.bf16.mxu0 %v4003_v38 }
 0x145   : > { %1743 = vmatpush1.bf16.msra.mxu0 %v4001_v39  ;;  %v4064_v39 = vld [vmem:[#allocation6 + $0x40] sm:$0xff]  }
 0x146   : > { %1744 = vmatprep.subr.bf16.mxu0 %v4006_v40  ;;  %v4065_v40 = vld [vmem:[#allocation6] sm:$0xff]   ;;  %3497 = vmatprep.subr.bf16.mxu1 %v4064_v39 }
 0x147   : > { %3498 = vmatpush3.bf16.msra.mxu1 %v4065_v40  ;;  %v4088_v40 = vld [vmem:[#allocation6 + $0xc0] sm:$0xff]  }
 0x149   : > { %1745 = vmatpush1.bf16.msra.mxu0 %v4004_v41  ;;  %v4066_v41 = vld [vmem:[#allocation6 + $0x48] sm:$0xff]  }
 0x14a   : > { %1746 = vmatprep.subr.bf16.mxu0 %v4009_v42  ;;  %v4067_v42 = vld [vmem:[#allocation6 + $0x8] sm:$0xff]   ;;  %3499 = vmatprep.subr.bf16.mxu1 %v4066_v41 }
 0x14b   : > { %3500 = vmatpush3.bf16.msra.mxu1 %v4067_v42  ;;  %v4089_v41 = vld [vmem:[#allocation6 + $0xc8] sm:$0xff]   ;;  %v4090_v42 = vld [vmem:[#allocation6 + $0xd0] sm:$0xff]  }
 0x14d   : > { %1747 = vmatpush1.bf16.msra.mxu0 %v4007_v43  ;;  %v4068_v43 = vld [vmem:[#allocation6 + $0x50] sm:$0xff]  }
 0x14e   : > { %1748 = vmatprep.subr.bf16.mxu0 %v4012_v44  ;;  %v4069_v44 = vld [vmem:[#allocation6 + $0x10] sm:$0xff]   ;;  %3501 = vmatprep.subr.bf16.mxu1 %v4068_v43  ;;  %v4091_v43 = vld [vmem:[#allocation6 + $0xd8] sm:$0xff]  }
 0x14f   : > { %3502 = vmatpush3.bf16.msra.mxu1 %v4069_v44  ;;  %v4092_v44 = vld [vmem:[#allocation6 + $0xe0] sm:$0xff]  }
 0x151   : > { %1749 = vmatpush1.bf16.msra.mxu0 %v4010_v45 }
 0x152   : > { %1750 = vmatprep.subr.bf16.mxu0 %v4015_v46 }
 0x155   : > { %1751 = vmatpush1.bf16.msra.mxu0 %v4013_v47 }
 0x156   : > { %1761 = vmatprep.subr.bf16.mxu0 %v4018_v48  ;;  %v4070_v48 = vld [vmem:[#allocation6 + $0x58] sm:$0xff]  }
 0x157   : > { %3503 = vmatprep.subr.bf16.mxu1 %v4070_v48 }
 0x158   : > { %1753 = vmatmul.mubr.bf16.vlgmr.msra.gmra.mrb[0].mxu0 %v4627_v53  ;;  %v4031_v53 = vld [vmem:[#allocation4 + $0x4f8] ss:$12 sps:$4 sm:$0xff]  }
 0x159   : > { %1762 = vmatpush1.bf16.msra.mxu0 %v4016_v49  ;;  %1793 = vmatprep.mubr.bf16.mxu0 %v4631_v6  ;;  %v4051_v6 = vld [vmem:[#allocation4 + $0x58c] ss:$12 sps:$4 sm:$0xff]  }
 0x15a   : > { %1763 = vmatprep.subr.bf16.mxu0 %v4021_v50  ;;  %v4071_v50 = vld [vmem:[#allocation6 + $0x18] sm:$0xff]  }
 0x15b   : > { %3504 = vmatpush3.bf16.msra.mxu1 %v4071_v50 }
 0x15d   : > { %1764 = vmatpush1.bf16.msra.mxu0 %v4019_v51 }
 0x15e   : > { %1765 = vmatprep.subr.bf16.mxu0 %v4024_v52 }
 0x161   : > { %1766 = vmatpush1.bf16.msra.mxu0 %v4022_v54  ;;  %v4072_v54 = vld [vmem:[#allocation6 + $0x60] sm:$0xff]  }
 0x162   : > { %1767 = vmatprep.subr.bf16.mxu0 %v4027_v55  ;;  %v4073_v55 = vld [vmem:[#allocation6 + $0x20] sm:$0xff]   ;;  %3505 = vmatprep.subr.bf16.mxu1 %v4072_v54 }
 0x163   : > { %3506 = vmatpush3.bf16.msra.mxu1 %v4073_v55  ;;  %v2031_v54 = vld [vmem:[#allocation9 + $0x1] ss:$0 sm:$0xff] }
 0x165   : > { %1768 = vmatpush1.bf16.msra.mxu0 %v4025_v56  ;;  %v4074_v56 = vld [vmem:[#allocation6 + $0x68] sm:$0xff]  }
 0x166   : > { %1769 = vmatprep.subr.bf16.mxu0 %v4030_v57  ;;  %v4075_v57 = vld [vmem:[#allocation6 + $0x28] sm:$0xff]   ;;  %3507 = vmatprep.subr.bf16.mxu1 %v4074_v56 }
 0x167   : > { %3508 = vmatpush3.bf16.msra.mxu1 %v4075_v57 }
 0x169   : > { %1770 = vmatpush1.bf16.msra.mxu0 %v4028_v58  ;;  %v4076_v58 = vld [vmem:[#allocation6 + $0x70] sm:$0xff]  }
 0x16a   : > { %1771 = vmatprep.subr.bf16.mxu0 %v4033_v59  ;;  %v4077_v59 = vld [vmem:[#allocation6 + $0x30] sm:$0xff]   ;;  %3509 = vmatprep.subr.bf16.mxu1 %v4076_v58 }
 0x16b   : > { %3510 = vmatpush3.bf16.msra.mxu1 %v4077_v59 }
 0x16d   : > { %1772 = vmatpush1.bf16.msra.mxu0 %v4031_v53  ;;  %v4078_v53 = vld [vmem:[#allocation6 + $0x78] sm:$0xff]  }
 0x16e   : > { %1773 = vmatprep.subr.bf16.mxu0 %v4036_v60  ;;  %v4079_v60 = vld [vmem:[#allocation6 + $0x38] sm:$0xff]   ;;  %3511 = vmatprep.subr.bf16.mxu1 %v4078_v53 }
 0x16f   : > { %3512 = vmatpush3.bf16.msra.mxu1 %v4079_v60 }
 0x171   : > { %1774 = vmatpush1.bf16.msra.mxu0 %v4034_v61  ;;  %v4369_v61 = vmov 0.0  }
 0x172   : > { %1775 = vmatprep.subr.bf16.mxu0 %v4039_v62  ;;  %3576 = vmatprep.subr.bf16.mxu1 %v4369_v61  ;;  %v601_v62 = vsub.s32 0, %v4643_v22 }
 0x175   : > { %1776 = vmatpush1.bf16.msra.mxu0 %v4037_v63  ;;  %v605_v63 = vsub.s32 1, %v4643_v22 }
 0x176   : > { %1777 = vmatprep.subr.bf16.mxu0 %v4042_v0  ;;  %v602_v0 = vrot.slane %v597_v25, %v601_v62 }
 0x179   : > { %1778 = vmatpush1.bf16.msra.mxu0 %v4040_v1  ;;  %v606_v1 = vrot.slane %v597_v25, %v605_v63 }
 0x17a   : > { %1779 = vmatprep.subr.bf16.mxu0 %v4045_v2 }
 0x17d   : > { %1780 = vmatpush1.bf16.msra.mxu0 %v4043_v3 }
 0x17e   : > { %1781 = vmatprep.subr.bf16.mxu0 %v4048_v4 }
 0x181   : > { %1782 = vmatpush1.bf16.msra.mxu0 %v4046_v5 }
 0x182   : > { %1783 = vmatprep.subr.bf16.mxu0 %v4051_v6 }
 0x185   : > { %1784 = vmatpush1.bf16.msra.mxu0 %v4049_v7 }
 0x186   : > { %1785 = vmatprep.subr.bf16.mxu0 %v4054_v8 }
 0x189   : > { %1786 = vmatpush1.bf16.msra.mxu0 %v4052_v9 }
 0x18a   : > { %1787 = vmatprep.subr.bf16.mxu0 %v4057_v10 }
 0x18d   : > { %1788 = vmatpush1.bf16.msra.mxu0 %v4055_v11 }
 0x18e   : > { %1789 = vmatprep.subr.bf16.mxu0 %v4060_v12  ;;  %v3425_v16 = vpop.f32.mrb[0].mxu1 }
 0x18f   : > { %v3426_v18 = vpop.f32.mrb[1].mxu1 }
 0x190   : > { %v3427_v19 = vadd.f32 %v3426_v18, %v3425_v16  ;;  %v3428_v20 = vpop.f32.mrb[2].mxu1 }
 0x191   : > { %1790 = vmatpush1.bf16.msra.mxu0 %v4058_v13  ;;  %v3429_v21 = vpop.f32.mrb[3].mxu1 }
 0x192   : > { %1791 = vmatprep.subr.bf16.mxu0 %v4063_v14  ;;  %v1837_v27 = vadd.f32 %v3427_v19, %v610_v26 }
 0x195   : > { %1792 = vmatpush1.bf16.msra.mxu0 %v4061_v15 }
 0x196   : > { %3636 = vmatprep.subr.bf16.mxu0 %v4369_v61 }
 0x198   : > { %1794 = vmatmul.mubr.bf16.vlgmr.msra.gmra.mrb[0].mxu0 %v4637_v24 }
 0x199   : > { %3652 = vmatprep.mubr.msk.bf16.mxu0 %vm4370_vm0, %v4369_v61 }
 0x1ae   : > { %v3447_v28 = vpop.f32.mrb[4].mxu1 }
 0x1af   : > { %v3448_v29 = vpop.f32.mrb[5].mxu1 }
 0x1b0   : > { %v3449_v30 = vadd.f32 %v3448_v29, %v3447_v28  ;;  %v3450_v31 = vpop.f32.mrb[6].mxu1  ;;  %v4081_v29 = vld [vmem:[#allocation6 + $0x88] sm:$0xff]  }
 0x1b1   : > { %v3451_v32 = vpop.f32.mrb[7].mxu1 }
 0x1b2   : > { %v1877_v33 = vadd.f32 %v3449_v30, %v1837_v27  ;;  %v4080_v27 = vld [vmem:[#allocation6 + $0x80] sm:$0xff]   ;;  %v4082_v30 = vld [vmem:[#allocation6 + $0x90] sm:$0xff]  }
 0x1ce   : > { %v3469_v24 = vpop.f32.mrb[8].mxu1 }
 0x1cf   : > { %v3470_v34 = vpop.f32.mrb[9].mxu1 }
 0x1d0   : > { %v3471_v35 = vadd.f32 %v3470_v34, %v3469_v24  ;;  %v3472_v36 = vpop.f32.mrb[10].mxu1  ;;  %v4084_v24 = vld [vmem:[#allocation6 + $0xa0] sm:$0xff]   ;;  %v4085_v34 = vld [vmem:[#allocation6 + $0xa8] sm:$0xff]  }
 0x1d1   : > { %v3473_v37 = vpop.f32.mrb[11].mxu1 }
 0x1d2   : > { %v1917_v38 = vadd.f32 %v3471_v35, %v1877_v33  ;;  %v4083_v33 = vld [vmem:[#allocation6 + $0x98] sm:$0xff]   ;;  %v4086_v35 = vld [vmem:[#allocation6 + $0xb0] sm:$0xff]  }
 0x1d3   : > { %v4087_v37 = vld [vmem:[#allocation6 + $0xb8] sm:$0xff]  }
 0x1ee   : > { %v3491_v45 = vpop.f32.mrb[12].mxu1 }
 0x1ef   : > { %v3492_v46 = vpop.f32.mrb[13].mxu1 }
 0x1f0   : > { %v3493_v47 = vadd.f32 %v3492_v46, %v3491_v45  ;;  %v3494_v49 = vpop.f32.mrb[14].mxu1  ;;  %v4093_v45 = vld [vmem:[#allocation6 + $0xe8] sm:$0xff]   ;;  %v4094_v46 = vld [vmem:[#allocation6 + $0xf0] sm:$0xff]  }
 0x1f1   : > { %v3495_v51 = vpop.f32.mrb[15].mxu1 }
 0x1f2   : > { %v4646_v52 = vadd.f32 %v3493_v47, %v1917_v38  ;;  %v4095_v47 = vld [vmem:[#allocation6 + $0xf8] sm:$0xff]  }
 0x1f4   : > { %v1964_v19 = vsub.f32 0.0, %v4646_v52 }
 0x1f6   : > { %v1967_v20 = vmin.f32 %v1964_v19, 80.0 }
 0x1f8   : > { %v1972_v21 = vmul.f32 1.442695, %v1967_v20 }
 0x26b   : > { %v1795_v2 = vpop.f32.mrb[0].mxu0 }
 0x26c   : > { %v3708_v3 = vadd.f32 %v1795_v2, %v602_v0  ;;  %v1797_v4 = vpop.f32.mrb[1].mxu0 }
 0x26d   : > { %v3709_v5 = vadd.f32 %v1797_v4, %v606_v1  ;;  %v1799_v6 = vpop.f32.mrb[2].mxu0 }
 0x26e   : > { %v1962_v7 = vsub.f32 0.0, %v3708_v3  ;;  %v1800_v8 = vpop.f32.mrb[3].mxu0  ;;  %v4097_v6 = vld [vmem:[#allocation6 + $0x108] sm:$0xff]  }
 0x26f   : > { %v1963_v9 = vsub.f32 0.0, %v3709_v5  ;;  %v4099_v8 = vld [vmem:[#allocation6 + $0x118] sm:$0xff]  }
 0x270   : > { %v1965_v10 = vmin.f32 %v1962_v7, 80.0  ;;  %v4098_v7 = vld [vmem:[#allocation6 + $0x110] sm:$0xff]  }
 0x271   : > { %v1966_v11 = vmin.f32 %v1963_v9, 80.0  ;;  %v4100_v9 = vld [vmem:[#allocation6 + $0x120] sm:$0xff]  }
 0x272   : > { %v1968_v12 = vmul.f32 1.442695, %v1965_v10  ;;  %v4101_v10 = vld [vmem:[#allocation6 + $0x128] sm:$0xff]  }
 0x273   : > { %v1970_v13 = vmul.f32 1.442695, %v1966_v11  ;;  %v4102_v11 = vld [vmem:[#allocation6 + $0x130] sm:$0xff]  }
 0x274   : > { %4128 = vpow2.f32 %v1968_v12  ;;  %v4103_v12 = vld [vmem:[#allocation6 + $0x138] sm:$0xff]  }
 0x275   : > { %4130 = vpow2.f32 %v1970_v13  ;;  %v2282_v13 = vld [vmem:[#allocation9 + $0x2] ss:$0 sm:$0xff] }
 0x27e   : > { %v4129_v14 = vpop.eup %4128 }
 0x27f   : > { %v4131_v15 = vpop.eup %4130  ;;  %v1974_v16 = vadd.f32 1.0, %v4129_v14 }
 0x280   : > { %v1975_v18 = vadd.f32 1.0, %v4131_v15 }
 0x281   : > { %4132 = vrcp.f32 %v1974_v16 }
 0x282   : > { %4134 = vrcp.f32 %v1975_v18 }
 0x283   : > { %4136 = vpow2.f32 %v1972_v21 }
 0x28b   : > { %v4133_v17 = vpop.eup %4132 }
 0x28c   : > { %v4135_v22 = vpop.eup %4134  ;;  %v1980_v23 = vmul.f32 %v4133_v17, %v3708_v3 }
 0x28d   : > { %v1981_v25 = vmul.f32 %v4135_v22, %v3709_v5  ;;  %v4137_v31 = vpop.eup %4136  ;;  %v4096_v5 = vld [vmem:[#allocation6 + $0x100] sm:$0xff]  }
 0x28e   : > { %v2032_v28 = vpack.c.bf16 %v1980_v23, %v1980_v23  ;;  %v1976_v32 = vadd.f32 1.0, %v4137_v31  ;;  %v4107_v31 = vld [vmem:[#allocation6 + $0x158] sm:$0xff]  }
 0x28f   : > { %v2033_v26 = vpack.c.bf16 %v1981_v25, %v1981_v25 }
 0x290   : > { %4138 = vrcp.f32 %v1976_v32  ;;  %v4108_v32 = vld [vmem:[#allocation6 + $0x160] sm:$0xff]  }
 0x291   : > { %2211 = vmatprep.mubr.bf16.mxu1 %v2033_v26 }
 0x292   : > { %2212 = vmatmul.mubr.bf16.vlgmr.msra.gmra.mrb[16].mxu1 %v2032_v28  ;;  %v4104_v28 = vld [vmem:[#allocation6 + $0x140] sm:$0xff]  }
 0x293   : > { %3577 = vmatpush3.bf16.msra.mxu1 %v4080_v27  ;;  %3592 = vmatprep.mubr.msk.bf16.mxu1 %vm4370_vm0, %v4369_v61 }
 0x294   : > { %3578 = vmatprep.subr.bf16.mxu1 %v4369_v61  ;;  %3637 = vmatpush3.bf16.msra.mxu0 %v4104_v28 }
 0x295   : > { %3638 = vmatprep.subr.bf16.mxu0 %v4369_v61 }
 0x297   : > { %3579 = vmatpush3.bf16.msra.mxu1 %v4081_v29  ;;  %v4105_v29 = vld [vmem:[#allocation6 + $0x148] sm:$0xff]  }
 0x298   : > { %3580 = vmatprep.subr.bf16.mxu1 %v4369_v61  ;;  %3639 = vmatpush3.bf16.msra.mxu0 %v4105_v29 }
 0x299   : > { %3640 = vmatprep.subr.bf16.mxu0 %v4369_v61 }
 0x29a   : > { %v4139_v36 = vpop.eup %4138 }
 0x29b   : > { %3581 = vmatpush3.bf16.msra.mxu1 %v4082_v30  ;;  %v1982_v38 = vmul.f32 %v4139_v36, %v4646_v52  ;;  %v4106_v30 = vld [vmem:[#allocation6 + $0x150] sm:$0xff]  }
 0x29c   : > { %3582 = vmatprep.subr.bf16.mxu1 %v4369_v61  ;;  %3641 = vmatpush3.bf16.msra.mxu0 %v4106_v30 }
 0x29d   : > { %v2034_v39 = vpack.c.bf16 %v1982_v38, %v1982_v38  ;;  %3642 = vmatprep.subr.bf16.mxu0 %v4369_v61 }
 0x29f   : > { %3583 = vmatpush3.bf16.msra.mxu1 %v4083_v33  ;;  %v4109_v33 = vld [vmem:[#allocation6 + $0x168] sm:$0xff]  }
 0x2a0   : > { %3584 = vmatprep.subr.bf16.mxu1 %v4369_v61  ;;  %3643 = vmatpush3.bf16.msra.mxu0 %v4107_v31 }
 0x2a1   : > { %3644 = vmatprep.subr.bf16.mxu0 %v4369_v61 }
 0x2a3   : > { %3585 = vmatpush3.bf16.msra.mxu1 %v4084_v24  ;;  %v4110_v24 = vld [vmem:[#allocation6 + $0x170] sm:$0xff]  }
 0x2a4   : > { %3586 = vmatprep.subr.bf16.mxu1 %v4369_v61  ;;  %3645 = vmatpush3.bf16.msra.mxu0 %v4108_v32 }
 0x2a5   : > { %3646 = vmatprep.subr.bf16.mxu0 %v4369_v61 }
 0x2a7   : > { %3587 = vmatpush3.bf16.msra.mxu1 %v4085_v34  ;;  %v4111_v34 = vld [vmem:[#allocation6 + $0x178] sm:$0xff]  }
 0x2a8   : > { %3588 = vmatprep.subr.bf16.mxu1 %v4369_v61  ;;  %3647 = vmatpush3.bf16.msra.mxu0 %v4109_v33 }
 0x2a9   : > { %3648 = vmatprep.subr.bf16.mxu0 %v4369_v61 }
 0x2ab   : > { %3589 = vmatpush3.bf16.msra.mxu1 %v4086_v35  ;;  %v2395_v35 = vld [vmem:[#allocation9 + $0x3] ss:$0 sm:$0xff] }
 0x2ac   : > { %3590 = vmatprep.subr.bf16.mxu1 %v4369_v61  ;;  %3649 = vmatpush3.bf16.msra.mxu0 %v4110_v24 }
 0x2ad   : > { %3650 = vmatprep.subr.bf16.mxu0 %v4369_v61 }
 0x2af   : > { %3591 = vmatpush3.bf16.msra.mxu1 %v4087_v37 }
 0x2b0   : > { %3596 = vmatprep.subr.bf16.mxu1 %v4369_v61  ;;  %3651 = vmatpush3.bf16.msra.mxu0 %v4111_v34 }
 0x2b1   : > { %3676 = vmatprep.subr.bf16.mxu0 %v4369_v61 }
 0x2b2   : > { %3593 = vmatmul.mubr.bf16.vlgmr.msra.gmra.mrb[20].mxu1 %v2034_v39 }
 0x2b3   : > { %3612 = vmatprep.mubr.msk.bf16.mxu1 %vm4370_vm0, %v4369_v61  ;;  %3597 = vmatpush3.bf16.msra.mxu1 %v4088_v40 }
 0x2b4   : > { %3598 = vmatprep.subr.bf16.mxu1 %v4369_v61 }
 0x2b7   : > { %3599 = vmatpush3.bf16.msra.mxu1 %v4089_v41 }
 0x2b8   : > { %3600 = vmatprep.subr.bf16.mxu1 %v4369_v61 }
 0x2bb   : > { %3601 = vmatpush3.bf16.msra.mxu1 %v4090_v42 }
 0x2bc   : > { %3602 = vmatprep.subr.bf16.mxu1 %v4369_v61 }
 0x2bf   : > { %3603 = vmatpush3.bf16.msra.mxu1 %v4091_v43 }
 0x2c0   : > { %3604 = vmatprep.subr.bf16.mxu1 %v4369_v61 }
 0x2c3   : > { %3605 = vmatpush3.bf16.msra.mxu1 %v4092_v44 }
 0x2c4   : > { %3606 = vmatprep.subr.bf16.mxu1 %v4369_v61 }
 0x2c7   : > { %3607 = vmatpush3.bf16.msra.mxu1 %v4093_v45 }
 0x2c8   : > { %3608 = vmatprep.subr.bf16.mxu1 %v4369_v61 }
 0x2cb   : > { %3609 = vmatpush3.bf16.msra.mxu1 %v4094_v46 }
 0x2cc   : > { %3610 = vmatprep.subr.bf16.mxu1 %v4369_v61 }
 0x2cf   : > { %3611 = vmatpush3.bf16.msra.mxu1 %v4095_v47 }
 0x2d0   : > { %3616 = vmatprep.subr.bf16.mxu1 %v4369_v61 }
 0x365   : > { %v3513_v48 = vpop.f32.mrb[16].mxu1 }
 0x366   : > { %v3514_v49 = vpop.f32.mrb[17].mxu1 }
 0x367   : > { %v3515_v50 = vadd.f32 %v3514_v49, %v3513_v48  ;;  %v3516_v51 = vpop.f32.mrb[18].mxu1  ;;  %v4112_v49 = vld [vmem:[#allocation7] sm:$0xff]  }
 0x368   : > { %v3517_v52 = vpop.f32.mrb[19].mxu1  ;;  %v4114_v51 = vld [vmem:[#allocation7 + $0x10] sm:$0xff]  }
 0x369   : > { %v2214_v55 = vadd.f32 %v3515_v50, %v2031_v54  ;;  %v4113_v50 = vld [vmem:[#allocation7 + $0x8] sm:$0xff]   ;;  %v4115_v52 = vld [vmem:[#allocation7 + $0x18] sm:$0xff]   ;;  %v4116_v54 = vld [vmem:[#allocation7 + $0x20] sm:$0xff]  }
 0x385   : > { %v2253_v56 = vpop.f32.mrb[20].mxu1 }
 0x386   : > { %v2254_v57 = vadd.f32 %v2253_v56, %v2214_v55  ;;  %v3594_v58 = vpop.f32.mrb[21].mxu1  ;;  %v4117_v55 = vld [vmem:[#allocation7 + $0x28] sm:$0xff]   ;;  %v4118_v56 = vld [vmem:[#allocation7 + $0x30] sm:$0xff]  }
 0x387   : > { %v2256_v59 = vpop.f32.mrb[22].mxu1  ;;  %v2508_v58 = vld [vmem:[#allocation9 + $0x4] ss:$0 sm:$0xff] }
 0x388   : > { %v2259_v53 = vsub.f32 0.0, %v2254_v57  ;;  %v3595_v60 = vpop.f32.mrb[23].mxu1 }
 0x38a   : > { %v2260_v62 = vmin.f32 %v2259_v53, 80.0 }
 0x38c   : > { %v2261_v63 = vmul.f32 1.442695, %v2260_v62 }
 0x38e   : > { %4140 = vpow2.f32 %v2261_v63 }
 0x398   : > { %v4141_v0 = vpop.eup %4140 }
 0x399   : > { %v2263_v1 = vadd.f32 1.0, %v4141_v0 }
 0x39b   : > { %4142 = vrcp.f32 %v2263_v1 }
 0x3a5   : > { %v4143_v2 = vpop.eup %4142 }
 0x3a6   : > { %v2265_v3 = vmul.f32 %v4143_v2, %v2254_v57  ;;  %v4119_v57 = vld [vmem:[#allocation7 + $0x38] sm:$0xff]  }
 0x3a8   : > { %v2283_v4 = vpack.c.bf16 %v2265_v3, %v2265_v3 }
 0x3aa   : > { %3613 = vmatmul.mubr.bf16.vlgmr.msra.gmra.mrb[24].mxu1 %v2283_v4 }
 0x3ab   : > { %3632 = vmatprep.mubr.msk.bf16.mxu1 %vm4370_vm0, %v4369_v61  ;;  %3617 = vmatpush3.bf16.msra.mxu1 %v4096_v5 }
 0x3ac   : > { %3618 = vmatprep.subr.bf16.mxu1 %v4369_v61 }
 0x3af   : > { %3619 = vmatpush3.bf16.msra.mxu1 %v4097_v6 }
 0x3b0   : > { %3620 = vmatprep.subr.bf16.mxu1 %v4369_v61 }
 0x3b3   : > { %3621 = vmatpush3.bf16.msra.mxu1 %v4098_v7 }
 0x3b4   : > { %3622 = vmatprep.subr.bf16.mxu1 %v4369_v61 }
 0x3b7   : > { %3623 = vmatpush3.bf16.msra.mxu1 %v4099_v8  ;;  %v3381_v8 = vld [vmem:[%s4762_s5] ss:$0 sm:$0xff] }
 0x3b8   : > { %3624 = vmatprep.subr.bf16.mxu1 %v4369_v61 }
 0x3bb   : > { %3625 = vmatpush3.bf16.msra.mxu1 %v4100_v9 }
 0x3bc   : > { %3626 = vmatprep.subr.bf16.mxu1 %v4369_v61 }
 0x3bf   : > { %3627 = vmatpush3.bf16.msra.mxu1 %v4101_v10 }
 0x3c0   : > { %3628 = vmatprep.subr.bf16.mxu1 %v4369_v61 }
 0x3c3   : > { %3629 = vmatpush3.bf16.msra.mxu1 %v4102_v11 }
 0x3c4   : > { %3630 = vmatprep.subr.bf16.mxu1 %v4369_v61 }
 0x3c7   : > { %3631 = vmatpush3.bf16.msra.mxu1 %v4103_v12 }
 0x3c8   : > { %3656 = vmatprep.subr.bf16.mxu1 %v4369_v61 }
 0x47d   : > { %v2366_v14 = vpop.f32.mrb[24].mxu1 }
 0x47e   : > { %v2367_v15 = vadd.f32 %v2366_v14, %v2282_v13  ;;  %v3614_v16 = vpop.f32.mrb[25].mxu1 }
 0x47f   : > { %v2369_v18 = vpop.f32.mrb[26].mxu1 }
 0x480   : > { %v2372_v19 = vsub.f32 0.0, %v2367_v15  ;;  %v3615_v20 = vpop.f32.mrb[27].mxu1 }
 0x482   : > { %v2373_v21 = vmin.f32 %v2372_v19, 80.0 }
 0x484   : > { %v2374_v17 = vmul.f32 1.442695, %v2373_v21  ;;  %v4120_v21 = vld [vmem:[#allocation7 + $0x40] sm:$0xff]  }
 0x486   : > { %4144 = vpow2.f32 %v2374_v17  ;;  %v4121_v17 = vld [vmem:[#allocation7 + $0x48] sm:$0xff]  }
 0x490   : > { %v4145_v22 = vpop.eup %4144 }
 0x491   : > { %v2376_v23 = vadd.f32 1.0, %v4145_v22 }
 0x493   : > { %4146 = vrcp.f32 %v2376_v23 }
 0x49d   : > { %v4147_v25 = vpop.eup %4146 }
 0x49e   : > { %v2378_v26 = vmul.f32 %v4147_v25, %v2367_v15 }
 0x4a0   : > { %v2396_v27 = vpack.c.bf16 %v2378_v26, %v2378_v26 }
 0x4a2   : > { %3633 = vmatmul.mubr.bf16.vlgmr.msra.gmra.mrb[28].mxu1 %v2396_v27 }
 0x4a3   : > { %3672 = vmatprep.mubr.msk.bf16.mxu1 %vm4370_vm0, %v4369_v61  ;;  %3657 = vmatpush3.bf16.msra.mxu1 %v4112_v49 }
 0x4a4   : > { %3658 = vmatprep.subr.bf16.mxu1 %v4369_v61 }
 0x4a7   : > { %3659 = vmatpush3.bf16.msra.mxu1 %v4113_v50 }
 0x4a8   : > { %3660 = vmatprep.subr.bf16.mxu1 %v4369_v61 }
 0x4ab   : > { %3661 = vmatpush3.bf16.msra.mxu1 %v4114_v51 }
 0x4ac   : > { %3662 = vmatprep.subr.bf16.mxu1 %v4369_v61 }
 0x4af   : > { %3663 = vmatpush3.bf16.msra.mxu1 %v4115_v52  ;;  %v4124_v52 = vld [vmem:[#allocation7 + $0x60] sm:$0xff]  }
 0x4b0   : > { %3664 = vmatprep.subr.bf16.mxu1 %v4369_v61 }
 0x4b3   : > { %3665 = vmatpush3.bf16.msra.mxu1 %v4116_v54  ;;  %v4125_v54 = vld [vmem:[#allocation7 + $0x68] sm:$0xff]  }
 0x4b4   : > { %3666 = vmatprep.subr.bf16.mxu1 %v4369_v61 }
 0x4b7   : > { %3667 = vmatpush3.bf16.msra.mxu1 %v4117_v55  ;;  %v3394_v55 = vld [vmem:[%s4762_s5 + $0x2] ss:$0 sm:$0xff] }
 0x4b8   : > { %3668 = vmatprep.subr.bf16.mxu1 %v4369_v61 }
 0x4bb   : > { %3669 = vmatpush3.bf16.msra.mxu1 %v4118_v56 }
 0x4bc   : > { %3670 = vmatprep.subr.bf16.mxu1 %v4369_v61 }
 0x4bf   : > { %3671 = vmatpush3.bf16.msra.mxu1 %v4119_v57 }
 0x4c0   : > { %3684 = vmatprep.subr.bf16.mxu1 %v4369_v61 }
 0x575   : > { %v2479_v36 = vpop.f32.mrb[28].mxu1 }
 0x576   : > { %v2480_v37 = vadd.f32 %v2479_v36, %v2395_v35  ;;  %v3634_v38 = vpop.f32.mrb[29].mxu1  ;;  %v4122_v35 = vld [vmem:[#allocation7 + $0x50] sm:$0xff]   ;;  %v4123_v36 = vld [vmem:[#allocation7 + $0x58] sm:$0xff]  }
 0x577   : > { %v2482_v39 = vpop.f32.mrb[30].mxu1 }
 0x578   : > { %v2485_v40 = vsub.f32 0.0, %v2480_v37  ;;  %v3635_v41 = vpop.f32.mrb[31].mxu1 }
 0x57a   : > { %v2486_v42 = vmin.f32 %v2485_v40, 80.0 }
 0x57c   : > { %v2487_v43 = vmul.f32 1.442695, %v2486_v42 }
 0x57e   : > { %4148 = vpow2.f32 %v2487_v43 }
 0x588   : > { %v4149_v44 = vpop.eup %4148 }
 0x589   : > { %v2489_v45 = vadd.f32 1.0, %v4149_v44 }
 0x58b   : > { %4150 = vrcp.f32 %v2489_v45 }
 0x595   : > { %v4151_v46 = vpop.eup %4150 }
 0x596   : > { %v2491_v47 = vmul.f32 %v4151_v46, %v2480_v37  ;;  %v3390_v37 = vld [vmem:[%s4762_s5 + $0x1] ss:$0 sm:$0xff] }
 0x598   : > { %v2509_v48 = vpack.c.bf16 %v2491_v47, %v2491_v47 }
 0x59a   : > { %3653 = vmatmul.mubr.bf16.vlgmr.msra.gmra.mrb[4].mxu0 %v2509_v48 }
 0x59b   : > { %3680 = vmatprep.mubr.msk.bf16.mxu0 %vm4370_vm0, %v4369_v61  ;;  %3677 = vmatpush3.bf16.msra.mxu0 %v4120_v21 }
 0x59c   : > { %3678 = vmatprep.subr.bf16.mxu0 %v4369_v61 }
 0x59f   : > { %3679 = vmatpush3.bf16.msra.mxu0 %v4121_v17  ;;  %v3402_v17 = vld [vmem:[%s4762_s5 + $0x4] ss:$0 sm:$0xff] }
 0x5a0   : > { %3692 = vmatprep.subr.bf16.mxu0 %v4369_v61 }
 0x66d   : > { %v2592_v59 = vpop.f32.mrb[4].mxu0 }
 0x66e   : > { %v2593_v53 = vadd.f32 %v2592_v59, %v2508_v58  ;;  %v3654_v60 = vpop.f32.mrb[5].mxu0 }
 0x66f   : > { %v2595_v62 = vpop.f32.mrb[6].mxu0 }
 0x670   : > { %v2598_v63 = vsub.f32 0.0, %v2593_v53  ;;  %v3655_v0 = vpop.f32.mrb[7].mxu0 }
 0x672   : > { %v2599_v1 = vmin.f32 %v2598_v63, 80.0 }
 0x674   : > { %v2600_v2 = vmul.f32 1.442695, %v2599_v1 }
 0x676   : > { %4152 = vpow2.f32 %v2600_v2 }
 0x680   : > { %v4153_v3 = vpop.eup %4152 }
 0x681   : > { %v2602_v4 = vadd.f32 1.0, %v4153_v3 }
 0x683   : > { %4154 = vrcp.f32 %v2602_v4 }
 0x68d   : > { %v4155_v5 = vpop.eup %4154 }
 0x68e   : > { %v2604_v6 = vmul.f32 %v4155_v5, %v2593_v53  ;;  %v4126_v5 = vld [vmem:[#allocation7 + $0x70] sm:$0xff]  }
 0x690   : > { %v2622_v7 = vpack.c.bf16 %v2604_v6, %v2604_v6  ;;  %v4127_v6 = vld [vmem:[#allocation7 + $0x78] sm:$0xff]  }
 0x692   : > { %3673 = vmatmul.mubr.bf16.vlgmr.msra.gmra.mrb[32].mxu1 %v2622_v7  ;;  %v3398_v7 = vld [vmem:[%s4762_s5 + $0x3] ss:$0 sm:$0xff] }
 0x693   : > { %3688 = vmatprep.mubr.msk.bf16.mxu1 %vm4370_vm0, %v4369_v61  ;;  %3685 = vmatpush3.bf16.msra.mxu1 %v4122_v35 }
 0x694   : > { %3686 = vmatprep.subr.bf16.mxu1 %v4369_v61 }
 0x697   : > { %3687 = vmatpush3.bf16.msra.mxu1 %v4123_v36 }
 0x698   : > { %3700 = vmatprep.subr.bf16.mxu1 %v4369_v61 }
 0x765   : > { %v2709_v9 = vpop.f32.mrb[32].mxu1 }
 0x766   : > { %v2710_v10 = vadd.f32 %v3381_v8, %v2709_v9  ;;  %v3674_v11 = vpop.f32.mrb[33].mxu1 }
 0x767   : > { %v2712_v12 = vpop.f32.mrb[34].mxu1 }
 0x768   : > { %v3675_v13 = vpop.f32.mrb[35].mxu1  ;;  %v2716_v14 = vsel %vm2715_vm1, %v2710_v10, 0.0 }
 0x769   : > { %2717 = vadd.xlane.f32.xlu0 %v2716_v14 }
 0x7f6   : > { %v2718_v15 = vpop.xlane.xlu0 %2717 }
 0x7f7   : > { %v2720_v16 = vmul.f32 0.03125, %v2718_v15 }
 0x7f9   : > { %v2721_v18 = vsub.f32 %v2710_v10, %v2720_v16 }
 0x7fb   : > { %v2722_v19 = vmul.f32 %v2721_v18, %v2721_v18 }
 0x7fd   : > { %v2723_v20 = vsel %vm2715_vm1, %v2722_v19, 0.0 }
 0x7fe   : > { %2724 = vadd.xlane.f32.xlu0 %v2723_v20 }
 0x88b   : > { %v2725_v22 = vpop.xlane.xlu0 %2724 }
 0x88c   : > { %v2726_v23 = vmul.f32 0.03125, %v2725_v22 }
 0x88e   : > { %v2727_v25 = vadd.f32 1e-05, %v2726_v23 }
 0x890   : > { %4156 = vrsqrt.f32 %v2727_v25 }
 0x89a   : > { %v4157_v26 = vpop.eup %4156 }
 0x89b   : > { %v2729_v27 = vmul.f32 %v4157_v26, %v2721_v18 }
 0x89d   : > { %v2730_v28 = vsub.f32 0.0, %v2729_v27 }
 0x89f   : > { %v2731_v29 = vmin.f32 %v2730_v28, 80.0 }
 0x8a1   : > { %v2732_v30 = vmul.f32 1.442695, %v2731_v29 }
 0x8a3   : > { %4158 = vpow2.f32 %v2732_v30 }
 0x8ad   : > { %v4159_v31 = vpop.eup %4158 }
 0x8ae   : > { %v2734_v32 = vadd.f32 1.0, %v4159_v31 }
 0x8b0   : > { %4160 = vrcp.f32 %v2734_v32 }
 0x8ba   : > { %v4161_v33 = vpop.eup %4160 }
 0x8bb   : > { %v2736_v24 = vmul.f32 %v4161_v33, %v2729_v27 }
 0x8bd   : > { %v2742_v34 = vpack.c.bf16 %v2736_v24, %v2736_v24 }
 0x8bf   : > { %3681 = vmatmul.mubr.msk.bf16.vlgmr.msra.gmra.mrb[8].mxu0 %vm2715_vm1, %v2742_v34 }
 0x8c0   : > { %3696 = vmatprep.mubr.msk.bf16.mxu0 %vm4370_vm0, %v4369_v61  ;;  %3693 = vmatpush3.bf16.msra.mxu0 %v4124_v52 }
 0x8c1   : > { %3694 = vmatprep.subr.bf16.mxu0 %v4369_v61 }
 0x8c4   : > { %3695 = vmatpush3.bf16.msra.mxu0 %v4125_v54 }
 0x992   : > { %v2796_v38 = vpop.f32.mrb[8].mxu0 }
 0x993   : > { %v2797_v39 = vadd.f32 %v3390_v37, %v2796_v38  ;;  %v3682_v40 = vpop.f32.mrb[9].mxu0 }
 0x994   : > { %v2799_v41 = vpop.f32.mrb[10].mxu0 }
 0x995   : > { %v2802_v42 = vsub.f32 0.0, %v2797_v39  ;;  %v3683_v43 = vpop.f32.mrb[11].mxu0 }
 0x997   : > { %v2803_v44 = vmin.f32 %v2802_v42, 80.0 }
 0x999   : > { %v2804_v45 = vmul.f32 1.442695, %v2803_v44 }
 0x99b   : > { %4162 = vpow2.f32 %v2804_v45 }
 0x9a5   : > { %v4163_v46 = vpop.eup %4162 }
 0x9a6   : > { %v2806_v47 = vadd.f32 1.0, %v4163_v46 }
 0x9a8   : > { %4164 = vrcp.f32 %v2806_v47 }
 0x9b2   : > { %v4165_v48 = vpop.eup %4164 }
 0x9b3   : > { %v2808_v49 = vmul.f32 %v4165_v48, %v2797_v39 }
 0x9b5   : > { %v2809_v50 = vadd.f32 %v2808_v49, %v2736_v24 }
 0x9b7   : > { %v2815_v51 = vpack.c.bf16 %v2809_v50, %v2809_v50 }
 0x9b9   : > { %3689 = vmatmul.mubr.msk.bf16.vlgmr.msra.gmra.mrb[36].mxu1 %vm2715_vm1, %v2815_v51 }
 0x9ba   : > { %3704 = vmatprep.mubr.msk.bf16.mxu1 %vm4370_vm0, %v4369_v61  ;;  %3701 = vmatpush3.bf16.msra.mxu1 %v4126_v5 }
 0x9bb   : > { %3702 = vmatprep.subr.bf16.mxu1 %v4369_v61 }
 0x9be   : > { %3703 = vmatpush3.bf16.msra.mxu1 %v4127_v6 }
 0xa8c   : > { %v2869_v56 = vpop.f32.mrb[36].mxu1 }
 0xa8d   : > { %v2870_v57 = vadd.f32 %v3394_v55, %v2869_v56  ;;  %v3690_v58 = vpop.f32.mrb[37].mxu1 }
 0xa8e   : > { %v2872_v59 = vpop.f32.mrb[38].mxu1 }
 0xa8f   : > { %v2875_v53 = vsub.f32 0.0, %v2870_v57  ;;  %v3691_v60 = vpop.f32.mrb[39].mxu1 }
 0xa91   : > { %v2876_v62 = vmin.f32 %v2875_v53, 80.0 }
 0xa93   : > { %v2877_v63 = vmul.f32 1.442695, %v2876_v62 }
 0xa95   : > { %4166 = vpow2.f32 %v2877_v63 }
 0xa9f   : > { %v4167_v0 = vpop.eup %4166 }
 0xaa0   : > { %v2879_v1 = vadd.f32 1.0, %v4167_v0 }
 0xaa2   : > { %4168 = vrcp.f32 %v2879_v1 }
 0xaac   : > { %v4169_v2 = vpop.eup %4168 }
 0xaad   : > { %v2881_v3 = vmul.f32 %v4169_v2, %v2870_v57 }
 0xaaf   : > { %v2887_v4 = vpack.c.bf16 %v2881_v3, %v2881_v3 }
 0xab1   : > { %3697 = vmatmul.mubr.msk.bf16.vlgmr.msra.gmra.mrb[12].mxu0 %vm2715_vm1, %v2887_v4 }
 0xb84   : > { %v2941_v8 = vpop.f32.mrb[12].mxu0 }
 0xb85   : > { %v2942_v9 = vadd.f32 %v3398_v7, %v2941_v8  ;;  %v3698_v10 = vpop.f32.mrb[13].mxu0 }
 0xb86   : > { %v2944_v11 = vpop.f32.mrb[14].mxu0 }
 0xb87   : > { %v2947_v12 = vsub.f32 0.0, %v2942_v9  ;;  %v3699_v13 = vpop.f32.mrb[15].mxu0 }
 0xb89   : > { %v2948_v14 = vmin.f32 %v2947_v12, 80.0 }
 0xb8b   : > { %v2949_v15 = vmul.f32 1.442695, %v2948_v14 }
 0xb8d   : > { %4170 = vpow2.f32 %v2949_v15 }
 0xb97   : > { %v4171_v16 = vpop.eup %4170 }
 0xb98   : > { %v2951_v18 = vadd.f32 1.0, %v4171_v16 }
 0xb9a   : > { %4172 = vrcp.f32 %v2951_v18 }
 0xba4   : > { %v4173_v61 = vpop.eup %4172 }
 0xba5   : > { %v2953_v19 = vmul.f32 %v4173_v61, %v2942_v9 }
 0xba7   : > { %v2954_v20 = vadd.f32 %v2953_v19, %v2881_v3 }
 0xba9   : > { %v2960_v21 = vpack.c.bf16 %v2954_v20, %v2954_v20 }
 0xbab   : > { %3705 = vmatmul.mubr.msk.bf16.vlgmr.msra.gmra.mrb[40].mxu1 %vm2715_vm1, %v2960_v21 }
 0xc7e   : > { %v3014_v22 = vpop.f32.mrb[40].mxu1 }
 0xc7f   : > { %v3015_v23 = vadd.f32 %v3402_v17, %v3014_v22  ;;  %v3706_v25 = vpop.f32.mrb[41].mxu1 }
 0xc80   : > { %v3017_v26 = vpop.f32.mrb[42].mxu1 }
 0xc81   : > { %3020 = vst [vmem:[%s323_s26] sm:$0xff] %v3015_v23  ;;  %v3707_v27 = vpop.f32.mrb[43].mxu1 }
 0xc82 PF: > { %p18_p12 = scmp.ge.s32.totalorder %s4540_s15, 6   ;;  %s4777_s21 = smov %s4350_s22 }
 0xc83   : > { %s4778_s22 = smov %s4354_s23  ;;  %s4779_s23 = smov %s4552_s14 }
 0xc84   : > { %s4780_s24 = smov %s4540_s15  ;;  %20 = sbr.rel (!%p18_p12) target bundleno = 5 (0x5), region = 100 }
 0xc8b   :  { %3040 = vsyncpa [#allocation3], 1 }
 0xc8c   :  { %3042 = vsyncpa [#allocation3 + $0x1], 1 }
 0xc8d   :  { %3043 = vsyncpa [#allocation5], 1 }
 0xc8e   :  { %3044 = vsyncpa [#allocation8], 1 }

</bundles_post_ra>
